<compile_context>
chip_gen: v6e
topology: v6e:2x2x1
jax: 0.10.0
libtpu: 0.0.40
codegen_flags: <defaults>
</compile_context>

<pallas_src>
import functools

import numpy as np
import jax
import jax.numpy as jnp
from jax.experimental import pallas as pl
from jax.experimental.pallas import tpu as pltpu


# ---------------------------------------------------------------------------
# Fused Pallas kernel: conv1 -> pool1 -> conv2 -> pool2 -> fc1 -> fc2
# ---------------------------------------------------------------------------
def _make_kernel(BB, H1, W1, Cin, C1, C2, F1):
    H2, W2 = H1 // 2, W1 // 2
    H3 = H2 // 2
    L = W1 * C1                      # 128-lane activation width
    KP1 = (W1 + 2) * Cin             # packed padded input row width
    f32 = jnp.float32

    def kernel(xp_ref, wb1_ref, b1_ref, wb2_ref, b2_ref,
               wfc1_ref, bfc1_ref, wfc2_ref, bfc2_ref, out_ref, xq_ref):
        # ---- conv1: 3 banded matmuls (one per kh). Output lane layout puts
        #      the 2x2-pool W partners exactly 64 lanes apart:
        #      col = (w % 2)*64 + (w // 2)*C1 + c1.
        acc1 = jnp.zeros((BB * H1, L), f32)
        for kh in range(3):
            rows = xp_ref[:, kh:kh + H1, :].reshape(BB * H1, KP1)
            acc1 = acc1 + jnp.dot(rows, wb1_ref[kh], preferred_element_type=f32)
        y1 = jnp.maximum(acc1 + b1_ref[...], 0.0)            # (BB*H1, 128)

        # ---- maxpool1: H via sublane pair max, W via half-rotation max.
        #      (roll by 64 of a 128-lane row is its own inverse, so the pool
        #      partners meet regardless of roll direction.)  Valid pooled
        #      values sit in lanes 0..63 as w2*C1 + c1 (duplicated in 64..127;
        #      conv2's band has zero rows there).
        y1p = y1.reshape(BB * H2, 2, L)
        ph1 = jnp.maximum(y1p[:, 0, :], y1p[:, 1, :])        # (BB*H2, 128)
        phm1 = jnp.maximum(ph1, pltpu.roll(ph1, L // 2, 1))

        # ---- conv2 H padding: zero only the 1-row halo, one bulk lane-dense
        #      interior store.
        xq_ref[:, 0, :] = jnp.zeros((BB, L), f32)
        xq_ref[:, H2 + 1, :] = jnp.zeros((BB, L), f32)
        xq_ref[:, 1:1 + H2, :] = phm1.reshape(BB, H2, L)

        # ---- conv2: 3 banded matmuls; W padding baked into the band.
        acc2 = jnp.zeros((BB * H2, L), f32)
        for kh in range(3):
            rows = xq_ref[:, kh:kh + H2, :].reshape(BB * H2, L)
            acc2 = acc2 + jnp.dot(rows, wb2_ref[kh], preferred_element_type=f32)
        y2 = jnp.maximum(acc2 + b2_ref[...], 0.0)   # col=(w2%2)*64+(w2//2)*C2+c2

        # ---- maxpool2 fused with fc1: per h3, pool (sublane pair max +
        #      half-roll max) then one K=128 matmul block; the PyTorch (C,H,W)
        #      flatten permutation is baked into wfc1.
        y2r = y2.reshape(BB, H2, L)
        acc_f = jnp.zeros((BB, F1), f32)
        for h3 in range(H3):
            ph = jnp.maximum(y2r[:, 2 * h3, :], y2r[:, 2 * h3 + 1, :])
            phm = jnp.maximum(ph, pltpu.roll(ph, L // 2, 1))
            acc_f = acc_f + jnp.dot(phm, wfc1_ref[h3], preferred_element_type=f32)
        hid = jnp.maximum(acc_f + bfc1_ref[...], 0.0)        # (BB, F1)

        # ---- fc2: single lane-dense (BB, 128) store.
        out_ref[...] = (jnp.dot(hid, wfc2_ref[...], preferred_element_type=f32)
                        + bfc2_ref[...]).astype(out_ref.dtype)

    return kernel


def _forward_call(xp3, p, block_b):
    Bp, Hp, KP1 = xp3.shape
    H1 = Hp - 2
    W1 = H1
    Cin = KP1 // (W1 + 2)
    L = p["wb1"].shape[2]
    C1 = L // W1
    W2 = W1 // 2
    C2 = L // W2
    H2 = H1 // 2
    H3 = p["wfc1"].shape[0]
    F1 = p["wfc1"].shape[2]

    kernel = _make_kernel(block_b, H1, W1, Cin, C1, C2, F1)

    def batch_spec(shape):
        nd = len(shape)
        return pl.BlockSpec((block_b,) + tuple(shape[1:]),
                            lambda i: (i,) + (0,) * (nd - 1))

    def full_spec(a):
        nd = a.ndim
        return pl.BlockSpec(a.shape, lambda i: (0,) * nd)

    weights = (p["wb1"], p["b1"], p["wb2"], p["b2"],
               p["wfc1"], p["bfc1"], p["wfc2"], p["bfc2"])

    flops = 2 * Bp * (H1 * KP1 * L * 3 + H2 * L * L * 3 + H3 * L * F1 + F1 * 128)
    wbytes = 4 * sum(int(np.prod(w.shape)) for w in weights)
    bytes_accessed = 4 * Bp * (Hp * KP1 + 128) + wbytes

    return pl.pallas_call(
        kernel,
        out_shape=jax.ShapeDtypeStruct((Bp, 128), jnp.float32),
        grid=(Bp // block_b,),
        in_specs=[batch_spec(xp3.shape)] + [full_spec(w) for w in weights],
        out_specs=pl.BlockSpec((block_b, 128), lambda i: (i, 0)),
        scratch_shapes=[pltpu.VMEM((block_b, H2 + 2, L), jnp.float32)],
        compiler_params=pltpu.CompilerParams(
            dimension_semantics=("parallel",)),
        cost_estimate=pl.CostEstimate(flops=int(flops), transcendentals=0,
                                      bytes_accessed=int(bytes_accessed)),
    )(xp3, *weights)


# ---------------------------------------------------------------------------
# One-time host-side weight re-layout (NOT jitted; call once, reuse the result)
# ---------------------------------------------------------------------------
def prepare_params(params):
    c1w = np.asarray(params["conv1_w"], np.float32)   # (C1, Cin, 3, 3)
    c1b = np.asarray(params["conv1_b"], np.float32)
    c2w = np.asarray(params["conv2_w"], np.float32)   # (C2, C1, 3, 3)
    c2b = np.asarray(params["conv2_b"], np.float32)
    f1w = np.asarray(params["fc1_w"], np.float32)     # (F1, C2*H3*W3)
    f1b = np.asarray(params["fc1_b"], np.float32)
    f2w = np.asarray(params["fc2_w"], np.float32)     # (n_cls, F1)
    f2b = np.asarray(params["fc2_b"], np.float32)

    C1, Cin = c1w.shape[0], c1w.shape[1]
    C2 = c2w.shape[0]
    F1, fin = f1w.shape
    H3 = W3 = int(round((fin // C2) ** 0.5))
    W2 = 2 * W3
    W1 = 2 * W2
    L = W1 * C1
    half = L // 2
    assert L == 128 and W2 * C2 == 128, \
        "banded layout assumes 128-lane conv activations (W1*C1 == W2*C2 == 128)"

    # conv1 band: (3, (W1+2)*Cin, 128); output col(w, co) = (w%2)*64+(w//2)*C1+co
    wb1 = np.zeros((3, (W1 + 2) * Cin, L), np.float32)
    for kh in range(3):
        for kw in range(3):
            for w in range(W1):
                base = (w % 2) * half + (w // 2) * C1
                for ci in range(Cin):
                    wb1[kh, (w + kw) * Cin + ci, base:base + C1] = c1w[:, ci, kh, kw]

    # conv2 band: (3, 128, 128); input rows = pooled1 lanes w2*C1+c1 (only
    # lanes 0..63 carry data, rows 64..127 stay zero); W padding via band clip.
    wb2 = np.zeros((3, L, L), np.float32)
    for kh in range(3):
        for kw in range(3):
            for wo in range(W2):
                wi = wo + kw - 1
                if not 0 <= wi < W2:
                    continue
                base = (wo % 2) * half + (wo // 2) * C2
                for ci in range(C1):
                    wb2[kh, wi * C1 + ci, base:base + C2] = c2w[:, ci, kh, kw]

    # fc1: (H3, 128, F1) blocks; pooled2 lanes w3*C2+c2 (0..63), PyTorch (C,H,W)
    # flatten permutation baked in, rows 64..127 zero.
    wfc1 = np.zeros((H3, L, F1), np.float32)
    for h3 in range(H3):
        for w3 in range(W3):
            for c2 in range(C2):
                wfc1[h3, w3 * C2 + c2, :] = f1w[:, c2 * (H3 * W3) + h3 * W3 + w3]

    n_cls = f2w.shape[0]
    wfc2 = np.zeros((F1, 128), np.float32)
    wfc2[:, :n_cls] = f2w.T
    bfc2 = np.zeros((1, 128), np.float32)
    bfc2[0, :n_cls] = f2b

    prepared = {
        "wb1": wb1, "b1": np.tile(c1b, W1)[None, :],   # lane % C1 == co
        "wb2": wb2, "b2": np.tile(c2b, W2)[None, :],   # lane % C2 == c2
        "wfc1": wfc1, "bfc1": f1b[None, :],
        "wfc2": wfc2, "bfc2": bfc2,
    }
    return {k: jnp.asarray(v) for k, v in prepared.items()}, n_cls


# ---------------------------------------------------------------------------
# Thin jitted wrappers (layout glue only)
# ---------------------------------------------------------------------------
@functools.partial(jax.jit, static_argnames=("n_cls", "block_b"))
def estimate_model_forward(prepared, x_nchw, n_cls=2, block_b=64):
    """Equivalent of EstimateModel.forward(x); x in PyTorch NCHW layout."""
    x = jnp.transpose(x_nchw, (0, 2, 3, 1)).astype(jnp.float32)   # NCHW -> NHWC
    B, H, W, Cin = x.shape
    xp = jnp.pad(x, ((0, 0), (1, 1), (1, 1), (0, 0)))
    xp3 = xp.reshape(B, H + 2, (W + 2) * Cin)                     # packed rows
    bb = B if B <= block_b else block_b
    Bp = ((B + bb - 1) // bb) * bb
    if Bp != B:
        xp3 = jnp.pad(xp3, ((0, Bp - B), (0, 0), (0, 0)))
    logits = _forward_call(xp3, prepared, bb)
    return logits[:B, :n_cls]


@functools.partial(jax.jit, static_argnames=("n_cls", "block_b"))
def estimate_model_estimate(prepared, x_nchw, n_cls=2, block_b=64):
    """Equivalent of EstimateModel.estimate(x): argmax over dim=1."""
    return jnp.argmax(
        estimate_model_forward(prepared, x_nchw, n_cls=n_cls, block_b=block_b),
        axis=1)


# ---------------------------------------------------------------------------
# Pure-JAX reference (NCHW, mirrors PyTorch) for a correctness check
# ---------------------------------------------------------------------------
def reference_forward(params, x):
    hp = jax.lax.Precision.HIGHEST

    def conv(x, w, b):
        dn = jax.lax.conv_dimension_numbers(
            x.shape, w.shape, ("NCHW", "OIHW", "NCHW"))
        y = jax.lax.conv_general_dilated(
            x, w, (1, 1), ((1, 1), (1, 1)), dimension_numbers=dn, precision=hp)
        return jax.nn.relu(y + b[None, :, None, None])

    def pool(x):
        return jax.lax.reduce_window(
            x, -jnp.inf, jax.lax.max, (1, 1, 2, 2), (1, 1, 2, 2), "VALID")

    y = pool(conv(x, params["conv1_w"], params["conv1_b"]))
    y = pool(conv(y, params["conv2_w"], params["conv2_b"]))
    y = y.reshape(y.shape[0], -1)
    y = jax.nn.relu(jnp.dot(y, params["fc1_w"].T, precision=hp) + params["fc1_b"])
    return jnp.dot(y, params["fc2_w"].T, precision=hp) + params["fc2_b"]


# ---------------------------------------------------------------------------
if __name__ == "__main__":
    key = jax.random.PRNGKey(0)
    keys = jax.random.split(key, 9)

    # Deterministic synthetic parameters (PyTorch layouts).
    params = {
        "conv1_w": jax.random.normal(keys[0], (8, 4, 3, 3), jnp.float32) * 0.05,
        "conv1_b": jax.random.normal(keys[1], (8,), jnp.float32) * 0.05,
        "conv2_w": jax.random.normal(keys[2], (16, 8, 3, 3), jnp.float32) * 0.05,
        "conv2_b": jax.random.normal(keys[3], (16,), jnp.float32) * 0.05,
        "fc1_w": jax.random.normal(keys[4], (32, 16 * 4 * 4), jnp.float32) * 0.05,
        "fc1_b": jax.random.normal(keys[5], (32,), jnp.float32) * 0.05,
        "fc2_w": jax.random.normal(keys[6], (2, 32), jnp.float32) * 0.05,
        "fc2_b": jax.random.normal(keys[7], (2,), jnp.float32) * 0.05,
    }

    # Input in PyTorch NCHW layout: (batch=2, channels=4, H=16, W=16).
    x = jax.random.normal(keys[8], (2, 4, 16, 16), jnp.float32)

    # One-time host-side weight re-layout (hoisted out of the jitted forward).
    prepared, n_cls = prepare_params(params)

    logits = jax.block_until_ready(
        estimate_model_forward(prepared, x, n_cls=n_cls))
    preds = jax.block_until_ready(
        estimate_model_estimate(prepared, x, n_cls=n_cls))
    assert logits.shape == (2, 2) and preds.shape == (2,)

    ref = jax.block_until_ready(reference_forward(params, x))
    assert jnp.allclose(logits, ref, atol=1e-4, rtol=1e-3), (logits, ref)
    assert jnp.array_equal(preds, jnp.argmax(ref, axis=1))

    print("KERNEL_OK")
</pallas_src>

<mosaic_0001>
module attributes {stable_mosaic.version = 11 : i64} {
  func.func @kernel(%arg0: i32, %arg1: memref<2x18x72xf32, #tpu.memory_space<vmem>>, %arg2: memref<3x72x128xf32, #tpu.memory_space<vmem>>, %arg3: memref<1x128xf32, #tpu.memory_space<vmem>>, %arg4: memref<3x128x128xf32, #tpu.memory_space<vmem>>, %arg5: memref<1x128xf32, #tpu.memory_space<vmem>>, %arg6: memref<4x128x32xf32, #tpu.memory_space<vmem>>, %arg7: memref<1x32xf32, #tpu.memory_space<vmem>>, %arg8: memref<32x128xf32, #tpu.memory_space<vmem>>, %arg9: memref<1x128xf32, #tpu.memory_space<vmem>>, %arg10: memref<2x128xf32, #tpu.memory_space<vmem>>, %arg11: memref<2x10x128xf32, #tpu.memory_space<vmem>>) attributes {dimension_semantics = [#tpu.dimension_semantics<parallel>], iteration_bounds = array<i64: 1>, scalar_prefetch = 0 : i64, scratch_operands = 1 : i64, tpu.core_type = #tpu.core_type<tc>, window_params = [{transform_indices = @transform_0, window_bounds = array<i64: 2, 18, 72>}, {pipeline_mode = #tpu.pipeline_mode<synchronous>, transform_indices = @transform_1, window_bounds = array<i64: 3, 72, 128>}, {pipeline_mode = #tpu.pipeline_mode<synchronous>, transform_indices = @transform_2, window_bounds = array<i64: 1, 128>}, {pipeline_mode = #tpu.pipeline_mode<synchronous>, transform_indices = @transform_3, window_bounds = array<i64: 3, 128, 128>}, {pipeline_mode = #tpu.pipeline_mode<synchronous>, transform_indices = @transform_4, window_bounds = array<i64: 1, 128>}, {pipeline_mode = #tpu.pipeline_mode<synchronous>, transform_indices = @transform_5, window_bounds = array<i64: 4, 128, 32>}, {pipeline_mode = #tpu.pipeline_mode<synchronous>, transform_indices = @transform_6, window_bounds = array<i64: 1, 32>}, {pipeline_mode = #tpu.pipeline_mode<synchronous>, transform_indices = @transform_7, window_bounds = array<i64: 32, 128>}, {pipeline_mode = #tpu.pipeline_mode<synchronous>, transform_indices = @transform_8, window_bounds = array<i64: 1, 128>}, {transform_indices = @transform_9, window_bounds = array<i64: 2, 128>}]} {
    %cst = arith.constant 0.000000e+00 : f32
    %0 = vector.broadcast %cst : f32 to vector<32x128xf32>
    %c0 = arith.constant 0 : index
    %c0_0 = arith.constant 0 : index
    %c0_1 = arith.constant 0 : index
    %1 = vector.load %arg1[%c0, %c0_0, %c0_1] : memref<2x18x72xf32, #tpu.memory_space<vmem>>, vector<2x16x72xf32>
    %2 = vector.shape_cast %1 : vector<2x16x72xf32> to vector<32x72xf32>
    %c0_2 = arith.constant 0 : index
    %c0_3 = arith.constant 0 : index
    %c0_4 = arith.constant 0 : index
    %3 = vector.load %arg2[%c0_2, %c0_3, %c0_4] : memref<3x72x128xf32, #tpu.memory_space<vmem>>, vector<1x72x128xf32>
    %4 = vector.shape_cast %3 : vector<1x72x128xf32> to vector<72x128xf32>
    %cst_5 = arith.constant dense<0.000000e+00> : vector<32x128xf32>
    %5 = tpu.matmul %2, %4, %cst_5 {dimension_numbers = #tpu.dot_dimension_numbers<[1], [0], [0], [1], [0, 0, 1, 1], [], []>} : vector<32x72xf32>, vector<72x128xf32>, vector<32x128xf32> -> vector<32x128xf32>
    %6 = arith.addf %0, %5 : vector<32x128xf32>
    %c0_6 = arith.constant 0 : index
    %c1 = arith.constant 1 : index
    %c0_7 = arith.constant 0 : index
    %7 = vector.load %arg1[%c0_6, %c1, %c0_7] : memref<2x18x72xf32, #tpu.memory_space<vmem>>, vector<2x16x72xf32>
    %8 = vector.shape_cast %7 : vector<2x16x72xf32> to vector<32x72xf32>
    %c1_8 = arith.constant 1 : index
    %c0_9 = arith.constant 0 : index
    %c0_10 = arith.constant 0 : index
    %9 = vector.load %arg2[%c1_8, %c0_9, %c0_10] : memref<3x72x128xf32, #tpu.memory_space<vmem>>, vector<1x72x128xf32>
    %10 = vector.shape_cast %9 : vector<1x72x128xf32> to vector<72x128xf32>
    %cst_11 = arith.constant dense<0.000000e+00> : vector<32x128xf32>
    %11 = tpu.matmul %8, %10, %cst_11 {dimension_numbers = #tpu.dot_dimension_numbers<[1], [0], [0], [1], [0, 0, 1, 1], [], []>} : vector<32x72xf32>, vector<72x128xf32>, vector<32x128xf32> -> vector<32x128xf32>
    %12 = arith.addf %6, %11 : vector<32x128xf32>
    %c0_12 = arith.constant 0 : index
    %c2 = arith.constant 2 : index
    %c0_13 = arith.constant 0 : index
    %13 = vector.load %arg1[%c0_12, %c2, %c0_13] : memref<2x18x72xf32, #tpu.memory_space<vmem>>, vector<2x16x72xf32>
    %14 = vector.shape_cast %13 : vector<2x16x72xf32> to vector<32x72xf32>
    %c2_14 = arith.constant 2 : index
    %c0_15 = arith.constant 0 : index
    %c0_16 = arith.constant 0 : index
    %15 = vector.load %arg2[%c2_14, %c0_15, %c0_16] : memref<3x72x128xf32, #tpu.memory_space<vmem>>, vector<1x72x128xf32>
    %16 = vector.shape_cast %15 : vector<1x72x128xf32> to vector<72x128xf32>
    %cst_17 = arith.constant dense<0.000000e+00> : vector<32x128xf32>
    %17 = tpu.matmul %14, %16, %cst_17 {dimension_numbers = #tpu.dot_dimension_numbers<[1], [0], [0], [1], [0, 0, 1, 1], [], []>} : vector<32x72xf32>, vector<72x128xf32>, vector<32x128xf32> -> vector<32x128xf32>
    %18 = arith.addf %12, %17 : vector<32x128xf32>
    %c0_18 = arith.constant 0 : index
    %c0_19 = arith.constant 0 : index
    %19 = vector.load %arg3[%c0_18, %c0_19] : memref<1x128xf32, #tpu.memory_space<vmem>>, vector<1x128xf32>
    %20 = vector.broadcast %19 : vector<1x128xf32> to vector<32x128xf32>
    %21 = arith.addf %18, %20 : vector<32x128xf32>
    %cst_20 = arith.constant 0.000000e+00 : f32
    %22 = vector.broadcast %cst_20 : f32 to vector<32x128xf32>
    %23 = arith.maximumf %21, %22 : vector<32x128xf32>
    %24 = vector.shape_cast %23 : vector<32x128xf32> to vector<16x2x128xf32>
    %25 = vector.extract_strided_slice %24 {offsets = [0, 0, 0], sizes = [16, 1, 128], strides = [1, 1, 1]} : vector<16x2x128xf32> to vector<16x1x128xf32>
    %26 = vector.shape_cast %25 : vector<16x1x128xf32> to vector<16x128xf32>
    %27 = vector.extract_strided_slice %24 {offsets = [0, 1, 0], sizes = [16, 1, 128], strides = [1, 1, 1]} : vector<16x2x128xf32> to vector<16x1x128xf32>
    %28 = vector.shape_cast %27 : vector<16x1x128xf32> to vector<16x128xf32>
    %29 = arith.maximumf %26, %28 : vector<16x128xf32>
    %c64_i32 = arith.constant 64 : i32
    %30 = tpu.dynamic_rotate %29 by %c64_i32 dim 1 : vector<16x128xf32>, i32 -> vector<16x128xf32>
    %31 = arith.maximumf %29, %30 : vector<16x128xf32>
    %cst_21 = arith.constant 0.000000e+00 : f32
    %32 = vector.broadcast %cst_21 : f32 to vector<2x128xf32>
    %c0_22 = arith.constant 0 : index
    %c0_23 = arith.constant 0 : index
    %c0_24 = arith.constant 0 : index
    %33 = vector.load %arg11[%c0_22, %c0_23, %c0_24] : memref<2x10x128xf32, #tpu.memory_space<vmem>>, vector<2x1x128xf32>
    %34 = vector.shape_cast %33 : vector<2x1x128xf32> to vector<2x128xf32>
    %35 = vector.shape_cast %32 : vector<2x128xf32> to vector<2x1x128xf32>
    tpu.vector_store %arg11[%c0_22, %c0_23, %c0_24], %35 {strides = array<i32>} : memref<2x10x128xf32, #tpu.memory_space<vmem>>, vector<2x1x128xf32>,
    %cst_25 = arith.constant 0.000000e+00 : f32
    %36 = vector.broadcast %cst_25 : f32 to vector<2x128xf32>
    %c0_26 = arith.constant 0 : index
    %c9 = arith.constant 9 : index
    %c0_27 = arith.constant 0 : index
    %37 = vector.load %arg11[%c0_26, %c9, %c0_27] : memref<2x10x128xf32, #tpu.memory_space<vmem>>, vector<2x1x128xf32>
    %38 = vector.shape_cast %37 : vector<2x1x128xf32> to vector<2x128xf32>
    %39 = vector.shape_cast %36 : vector<2x128xf32> to vector<2x1x128xf32>
    tpu.vector_store %arg11[%c0_26, %c9, %c0_27], %39 {strides = array<i32>} : memref<2x10x128xf32, #tpu.memory_space<vmem>>, vector<2x1x128xf32>,
    %40 = vector.shape_cast %31 : vector<16x128xf32> to vector<2x8x128xf32>
    %c0_28 = arith.constant 0 : index
    %c1_29 = arith.constant 1 : index
    %c0_30 = arith.constant 0 : index
    %41 = vector.load %arg11[%c0_28, %c1_29, %c0_30] : memref<2x10x128xf32, #tpu.memory_space<vmem>>, vector<2x8x128xf32>
    tpu.vector_store %arg11[%c0_28, %c1_29, %c0_30], %40 {strides = array<i32>} : memref<2x10x128xf32, #tpu.memory_space<vmem>>, vector<2x8x128xf32>,
    %cst_31 = arith.constant 0.000000e+00 : f32
    %42 = vector.broadcast %cst_31 : f32 to vector<16x128xf32>
    %c0_32 = arith.constant 0 : index
    %c0_33 = arith.constant 0 : index
    %c0_34 = arith.constant 0 : index
    %43 = vector.load %arg11[%c0_32, %c0_33, %c0_34] : memref<2x10x128xf32, #tpu.memory_space<vmem>>, vector<2x8x128xf32>
    %44 = vector.shape_cast %43 : vector<2x8x128xf32> to vector<16x128xf32>
    %c0_35 = arith.constant 0 : index
    %c0_36 = arith.constant 0 : index
    %c0_37 = arith.constant 0 : index
    %45 = vector.load %arg4[%c0_35, %c0_36, %c0_37] : memref<3x128x128xf32, #tpu.memory_space<vmem>>, vector<1x128x128xf32>
    %46 = vector.shape_cast %45 : vector<1x128x128xf32> to vector<128x128xf32>
    %cst_38 = arith.constant dense<0.000000e+00> : vector<16x128xf32>
    %47 = tpu.matmul %44, %46, %cst_38 {dimension_numbers = #tpu.dot_dimension_numbers<[1], [0], [0], [1], [0, 0, 1, 1], [], []>} : vector<16x128xf32>, vector<128x128xf32>, vector<16x128xf32> -> vector<16x128xf32>
    %48 = arith.addf %42, %47 : vector<16x128xf32>
    %c0_39 = arith.constant 0 : index
    %c1_40 = arith.constant 1 : index
    %c0_41 = arith.constant 0 : index
    %49 = vector.load %arg11[%c0_39, %c1_40, %c0_41] : memref<2x10x128xf32, #tpu.memory_space<vmem>>, vector<2x8x128xf32>
    %50 = vector.shape_cast %49 : vector<2x8x128xf32> to vector<16x128xf32>
    %c1_42 = arith.constant 1 : index
    %c0_43 = arith.constant 0 : index
    %c0_44 = arith.constant 0 : index
    %51 = vector.load %arg4[%c1_42, %c0_43, %c0_44] : memref<3x128x128xf32, #tpu.memory_space<vmem>>, vector<1x128x128xf32>
    %52 = vector.shape_cast %51 : vector<1x128x128xf32> to vector<128x128xf32>
    %cst_45 = arith.constant dense<0.000000e+00> : vector<16x128xf32>
    %53 = tpu.matmul %50, %52, %cst_45 {dimension_numbers = #tpu.dot_dimension_numbers<[1], [0], [0], [1], [0, 0, 1, 1], [], []>} : vector<16x128xf32>, vector<128x128xf32>, vector<16x128xf32> -> vector<16x128xf32>
    %54 = arith.addf %48, %53 : vector<16x128xf32>
    %c0_46 = arith.constant 0 : index
    %c2_47 = arith.constant 2 : index
    %c0_48 = arith.constant 0 : index
    %55 = vector.load %arg11[%c0_46, %c2_47, %c0_48] : memref<2x10x128xf32, #tpu.memory_space<vmem>>, vector<2x8x128xf32>
    %56 = vector.shape_cast %55 : vector<2x8x128xf32> to vector<16x128xf32>
    %c2_49 = arith.constant 2 : index
    %c0_50 = arith.constant 0 : index
    %c0_51 = arith.constant 0 : index
    %57 = vector.load %arg4[%c2_49, %c0_50, %c0_51] : memref<3x128x128xf32, #tpu.memory_space<vmem>>, vector<1x128x128xf32>
    %58 = vector.shape_cast %57 : vector<1x128x128xf32> to vector<128x128xf32>
    %cst_52 = arith.constant dense<0.000000e+00> : vector<16x128xf32>
    %59 = tpu.matmul %56, %58, %cst_52 {dimension_numbers = #tpu.dot_dimension_numbers<[1], [0], [0], [1], [0, 0, 1, 1], [], []>} : vector<16x128xf32>, vector<128x128xf32>, vector<16x128xf32> -> vector<16x128xf32>
    %60 = arith.addf %54, %59 : vector<16x128xf32>
    %c0_53 = arith.constant 0 : index
    %c0_54 = arith.constant 0 : index
    %61 = vector.load %arg5[%c0_53, %c0_54] : memref<1x128xf32, #tpu.memory_space<vmem>>, vector<1x128xf32>
    %62 = vector.broadcast %61 : vector<1x128xf32> to vector<16x128xf32>
    %63 = arith.addf %60, %62 : vector<16x128xf32>
    %cst_55 = arith.constant 0.000000e+00 : f32
    %64 = vector.broadcast %cst_55 : f32 to vector<16x128xf32>
    %65 = arith.maximumf %63, %64 : vector<16x128xf32>
    %66 = vector.shape_cast %65 : vector<16x128xf32> to vector<2x8x128xf32>
    %cst_56 = arith.constant 0.000000e+00 : f32
    %67 = vector.broadcast %cst_56 : f32 to vector<2x32xf32>
    %68 = vector.extract_strided_slice %66 {offsets = [0, 0, 0], sizes = [2, 1, 128], strides = [1, 1, 1]} : vector<2x8x128xf32> to vector<2x1x128xf32>
    %69 = vector.shape_cast %68 : vector<2x1x128xf32> to vector<2x128xf32>
    %70 = vector.extract_strided_slice %66 {offsets = [0, 1, 0], sizes = [2, 1, 128], strides = [1, 1, 1]} : vector<2x8x128xf32> to vector<2x1x128xf32>
    %71 = vector.shape_cast %70 : vector<2x1x128xf32> to vector<2x128xf32>
    %72 = arith.maximumf %69, %71 : vector<2x128xf32>
    %c64_i32_57 = arith.constant 64 : i32
    %73 = tpu.dynamic_rotate %72 by %c64_i32_57 dim 1 : vector<2x128xf32>, i32 -> vector<2x128xf32>
    %74 = arith.maximumf %72, %73 : vector<2x128xf32>
    %c0_58 = arith.constant 0 : index
    %c0_59 = arith.constant 0 : index
    %c0_60 = arith.constant 0 : index
    %75 = vector.load %arg6[%c0_58, %c0_59, %c0_60] : memref<4x128x32xf32, #tpu.memory_space<vmem>>, vector<1x128x32xf32>
    %76 = vector.shape_cast %75 : vector<1x128x32xf32> to vector<128x32xf32>
    %cst_61 = arith.constant dense<0.000000e+00> : vector<2x32xf32>
    %77 = tpu.matmul %74, %76, %cst_61 {dimension_numbers = #tpu.dot_dimension_numbers<[1], [0], [0], [1], [0, 0, 1, 1], [], []>} : vector<2x128xf32>, vector<128x32xf32>, vector<2x32xf32> -> vector<2x32xf32>
    %78 = arith.addf %67, %77 : vector<2x32xf32>
    %79 = vector.extract_strided_slice %66 {offsets = [0, 2, 0], sizes = [2, 1, 128], strides = [1, 1, 1]} : vector<2x8x128xf32> to vector<2x1x128xf32>
    %80 = vector.shape_cast %79 : vector<2x1x128xf32> to vector<2x128xf32>
    %81 = vector.extract_strided_slice %66 {offsets = [0, 3, 0], sizes = [2, 1, 128], strides = [1, 1, 1]} : vector<2x8x128xf32> to vector<2x1x128xf32>
    %82 = vector.shape_cast %81 : vector<2x1x128xf32> to vector<2x128xf32>
    %83 = arith.maximumf %80, %82 : vector<2x128xf32>
    %c64_i32_62 = arith.constant 64 : i32
    %84 = tpu.dynamic_rotate %83 by %c64_i32_62 dim 1 : vector<2x128xf32>, i32 -> vector<2x128xf32>
    %85 = arith.maximumf %83, %84 : vector<2x128xf32>
    %c1_63 = arith.constant 1 : index
    %c0_64 = arith.constant 0 : index
    %c0_65 = arith.constant 0 : index
    %86 = vector.load %arg6[%c1_63, %c0_64, %c0_65] : memref<4x128x32xf32, #tpu.memory_space<vmem>>, vector<1x128x32xf32>
    %87 = vector.shape_cast %86 : vector<1x128x32xf32> to vector<128x32xf32>
    %cst_66 = arith.constant dense<0.000000e+00> : vector<2x32xf32>
    %88 = tpu.matmul %85, %87, %cst_66 {dimension_numbers = #tpu.dot_dimension_numbers<[1], [0], [0], [1], [0, 0, 1, 1], [], []>} : vector<2x128xf32>, vector<128x32xf32>, vector<2x32xf32> -> vector<2x32xf32>
    %89 = arith.addf %78, %88 : vector<2x32xf32>
    %90 = vector.extract_strided_slice %66 {offsets = [0, 4, 0], sizes = [2, 1, 128], strides = [1, 1, 1]} : vector<2x8x128xf32> to vector<2x1x128xf32>
    %91 = vector.shape_cast %90 : vector<2x1x128xf32> to vector<2x128xf32>
    %92 = vector.extract_strided_slice %66 {offsets = [0, 5, 0], sizes = [2, 1, 128], strides = [1, 1, 1]} : vector<2x8x128xf32> to vector<2x1x128xf32>
    %93 = vector.shape_cast %92 : vector<2x1x128xf32> to vector<2x128xf32>
    %94 = arith.maximumf %91, %93 : vector<2x128xf32>
    %c64_i32_67 = arith.constant 64 : i32
    %95 = tpu.dynamic_rotate %94 by %c64_i32_67 dim 1 : vector<2x128xf32>, i32 -> vector<2x128xf32>
    %96 = arith.maximumf %94, %95 : vector<2x128xf32>
    %c2_68 = arith.constant 2 : index
    %c0_69 = arith.constant 0 : index
    %c0_70 = arith.constant 0 : index
    %97 = vector.load %arg6[%c2_68, %c0_69, %c0_70] : memref<4x128x32xf32, #tpu.memory_space<vmem>>, vector<1x128x32xf32>
    %98 = vector.shape_cast %97 : vector<1x128x32xf32> to vector<128x32xf32>
    %cst_71 = arith.constant dense<0.000000e+00> : vector<2x32xf32>
    %99 = tpu.matmul %96, %98, %cst_71 {dimension_numbers = #tpu.dot_dimension_numbers<[1], [0], [0], [1], [0, 0, 1, 1], [], []>} : vector<2x128xf32>, vector<128x32xf32>, vector<2x32xf32> -> vector<2x32xf32>
    %100 = arith.addf %89, %99 : vector<2x32xf32>
    %101 = vector.extract_strided_slice %66 {offsets = [0, 6, 0], sizes = [2, 1, 128], strides = [1, 1, 1]} : vector<2x8x128xf32> to vector<2x1x128xf32>
    %102 = vector.shape_cast %101 : vector<2x1x128xf32> to vector<2x128xf32>
    %103 = vector.extract_strided_slice %66 {offsets = [0, 7, 0], sizes = [2, 1, 128], strides = [1, 1, 1]} : vector<2x8x128xf32> to vector<2x1x128xf32>
    %104 = vector.shape_cast %103 : vector<2x1x128xf32> to vector<2x128xf32>
    %105 = arith.maximumf %102, %104 : vector<2x128xf32>
    %c64_i32_72 = arith.constant 64 : i32
    %106 = tpu.dynamic_rotate %105 by %c64_i32_72 dim 1 : vector<2x128xf32>, i32 -> vector<2x128xf32>
    %107 = arith.maximumf %105, %106 : vector<2x128xf32>
    %c3 = arith.constant 3 : index
    %c0_73 = arith.constant 0 : index
    %c0_74 = arith.constant 0 : index
    %108 = vector.load %arg6[%c3, %c0_73, %c0_74] : memref<4x128x32xf32, #tpu.memory_space<vmem>>, vector<1x128x32xf32>
    %109 = vector.shape_cast %108 : vector<1x128x32xf32> to vector<128x32xf32>
    %cst_75 = arith.constant dense<0.000000e+00> : vector<2x32xf32>
    %110 = tpu.matmul %107, %109, %cst_75 {dimension_numbers = #tpu.dot_dimension_numbers<[1], [0], [0], [1], [0, 0, 1, 1], [], []>} : vector<2x128xf32>, vector<128x32xf32>, vector<2x32xf32> -> vector<2x32xf32>
    %111 = arith.addf %100, %110 : vector<2x32xf32>
    %c0_76 = arith.constant 0 : index
    %c0_77 = arith.constant 0 : index
    %112 = vector.load %arg7[%c0_76, %c0_77] : memref<1x32xf32, #tpu.memory_space<vmem>>, vector<1x32xf32>
    %113 = vector.broadcast %112 : vector<1x32xf32> to vector<2x32xf32>
    %114 = arith.addf %111, %113 : vector<2x32xf32>
    %cst_78 = arith.constant 0.000000e+00 : f32
    %115 = vector.broadcast %cst_78 : f32 to vector<2x32xf32>
    %116 = arith.maximumf %114, %115 : vector<2x32xf32>
    %c0_79 = arith.constant 0 : index
    %c0_80 = arith.constant 0 : index
    %117 = vector.load %arg8[%c0_79, %c0_80] : memref<32x128xf32, #tpu.memory_space<vmem>>, vector<32x128xf32>
    %cst_81 = arith.constant dense<0.000000e+00> : vector<2x128xf32>
    %118 = tpu.matmul %116, %117, %cst_81 {dimension_numbers = #tpu.dot_dimension_numbers<[1], [0], [0], [1], [0, 0, 1, 1], [], []>} : vector<2x32xf32>, vector<32x128xf32>, vector<2x128xf32> -> vector<2x128xf32>
    %c0_82 = arith.constant 0 : index
    %c0_83 = arith.constant 0 : index
    %119 = vector.load %arg9[%c0_82, %c0_83] : memref<1x128xf32, #tpu.memory_space<vmem>>, vector<1x128xf32>
    %120 = vector.broadcast %119 : vector<1x128xf32> to vector<2x128xf32>
    %121 = arith.addf %118, %120 : vector<2x128xf32>
    %c0_84 = arith.constant 0 : index
    %c0_85 = arith.constant 0 : index
    %122 = vector.load %arg10[%c0_84, %c0_85] : memref<2x128xf32, #tpu.memory_space<vmem>>, vector<2x128xf32>
    tpu.vector_store %arg10[%c0_84, %c0_85], %121 {strides = array<i32>} : memref<2x128xf32, #tpu.memory_space<vmem>>, vector<2x128xf32>,
    return
  }
  func.func @transform_0(%arg0: i32) -> (i32, i32, i32) {
    %c0_i32 = arith.constant 0 : i32
    %c0_i32_0 = arith.constant 0 : i32
    %c0_i32_1 = arith.constant 0 : i32
    return %arg0, %c0_i32, %c0_i32_0 : i32, i32, i32
  }
  func.func @transform_1(%arg0: i32) -> (i32, i32, i32) {
    %c0_i32 = arith.constant 0 : i32
    %c0_i32_0 = arith.constant 0 : i32
    %c0_i32_1 = arith.constant 0 : i32
    %c0_i32_2 = arith.constant 0 : i32
    return %c0_i32, %c0_i32_0, %c0_i32_1 : i32, i32, i32
  }
  func.func @transform_2(%arg0: i32) -> (i32, i32) {
    %c0_i32 = arith.constant 0 : i32
    %c0_i32_0 = arith.constant 0 : i32
    %c0_i32_1 = arith.constant 0 : i32
    return %c0_i32, %c0_i32_0 : i32, i32
  }
  func.func @transform_3(%arg0: i32) -> (i32, i32, i32) {
    %c0_i32 = arith.constant 0 : i32
    %c0_i32_0 = arith.constant 0 : i32
    %c0_i32_1 = arith.constant 0 : i32
    %c0_i32_2 = arith.constant 0 : i32
    return %c0_i32, %c0_i32_0, %c0_i32_1 : i32, i32, i32
  }
  func.func @transform_4(%arg0: i32) -> (i32, i32) {
    %c0_i32 = arith.constant 0 : i32
    %c0_i32_0 = arith.constant 0 : i32
    %c0_i32_1 = arith.constant 0 : i32
    return %c0_i32, %c0_i32_0 : i32, i32
  }
  func.func @transform_5(%arg0: i32) -> (i32, i32, i32) {
    %c0_i32 = arith.constant 0 : i32
    %c0_i32_0 = arith.constant 0 : i32
    %c0_i32_1 = arith.constant 0 : i32
    %c0_i32_2 = arith.constant 0 : i32
    return %c0_i32, %c0_i32_0, %c0_i32_1 : i32, i32, i32
  }
  func.func @transform_6(%arg0: i32) -> (i32, i32) {
    %c0_i32 = arith.constant 0 : i32
    %c0_i32_0 = arith.constant 0 : i32
    %c0_i32_1 = arith.constant 0 : i32
    return %c0_i32, %c0_i32_0 : i32, i32
  }
  func.func @transform_7(%arg0: i32) -> (i32, i32) {
    %c0_i32 = arith.constant 0 : i32
    %c0_i32_0 = arith.constant 0 : i32
    %c0_i32_1 = arith.constant 0 : i32
    return %c0_i32, %c0_i32_0 : i32, i32
  }
  func.func @transform_8(%arg0: i32) -> (i32, i32) {
    %c0_i32 = arith.constant 0 : i32
    %c0_i32_0 = arith.constant 0 : i32
    %c0_i32_1 = arith.constant 0 : i32
    return %c0_i32, %c0_i32_0 : i32, i32
  }
  func.func @transform_9(%arg0: i32) -> (i32, i32) {
    %c0_i32 = arith.constant 0 : i32
    %c0_i32_0 = arith.constant 0 : i32
    return %arg0, %c0_i32 : i32, i32
  }
}

</mosaic_0001>

<bundles_post_ra>
// kernel: estimate_model_forward.1
= control target key start
LH: loop header
LB: loop body
LE: loop exit
PB: predicated region body
PF: predicated region fallthrough
CT: control target
= control target key end

     0   :  { %s3122_s0 = inlined_call_operand.vmem [shape: f32[2,18,72], index: 0, kind: input, shape index: {}]   ;;  %s3123_s1 = inlined_call_operand.vmem [shape: f32[3,72,128], index: 1, kind: input, shape index: {}]   ;;  %s3124_s2 = inlined_call_operand.vmem [shape: f32[1,128], index: 2, kind: input, shape index: {}]   ;;  %s3125_s3 = inlined_call_operand.vmem [shape: f32[3,128,128], index: 3, kind: input, shape index: {}]   ;;  %s3126_s4 = inlined_call_operand.vmem [shape: f32[1,128], index: 4, kind: input, shape index: {}]   ;;  %s3127_s5 = inlined_call_operand.vmem [shape: f32[4,128,32], index: 5, kind: input, shape index: {}]   ;;  %s3128_s6 = inlined_call_operand.vmem [shape: f32[1,32], index: 6, kind: input, shape index: {}]   ;;  %s3129_s7 = inlined_call_operand.vmem [shape: f32[32,128], index: 7, kind: input, shape index: {}]   ;;  %s3130_s8 = inlined_call_operand.vmem [shape: f32[1,128], index: 8, kind: input, shape index: {}]   ;;  %s3131_s9 = inlined_call_operand.hbm [shape: f32[2,128], index: 9, kind: output, shape index: {}]  }
   0x1   :  { %v1665_v0 = vld [vmem:[%s3123_s1 + $0x88] sm:$0xff]  ;;  %v45_v1 = vld [vmem:[%s3123_s1 + $0x40] sm:$0xff]  ;;  %v44_v3 = vld [vmem:[%s3123_s1 + $0x38] sm:$0xff] }
   0x2   :  { %v1664_v2 = vld [vmem:[%s3123_s1 + $0x80] sm:$0xff]  ;;  %1954 = vmatprep.subr.mxu0 %v1665_v0  ;;  %1978 = vmatprep.subr.mxu1 %v45_v1  ;;  %v1663_v4 = vld [vmem:[%s3123_s1 + $0x78] sm:$0xff]  ;;  %v43_v5 = vld [vmem:[%s3123_s1 + $0x30] sm:$0xff] }
   0x3   :  { %1955 = vmatpush3.msra.mxu0 %v1665_v0  ;;  %1979 = vmatpush3.msra.mxu1 %v45_v1  ;;  %v1662_v6 = vld [vmem:[%s3123_s1 + $0x70] sm:$0xff]  ;;  %v42_v7 = vld [vmem:[%s3123_s1 + $0x28] sm:$0xff]  ;;  %v41_v9 = vld [vmem:[%s3123_s1 + $0x20] sm:$0xff] }
   0x4   :  { %1956 = vmatprep.subr.mxu0 %v1664_v2  ;;  %1980 = vmatprep.subr.mxu1 %v44_v3  ;;  %v1661_v8 = vld [vmem:[%s3123_s1 + $0x68] sm:$0xff]  ;;  %v1660_v10 = vld [vmem:[%s3123_s1 + $0x60] sm:$0xff]  ;;  %v40_v11 = vld [vmem:[%s3123_s1 + $0x18] sm:$0xff] }
   0x5   :  { %1957 = vmatpush3.msra.mxu0 %v1664_v2  ;;  %1981 = vmatpush3.msra.mxu1 %v44_v3  ;;  %v1659_v12 = vld [vmem:[%s3123_s1 + $0x58] sm:$0xff]  ;;  %v39_v13 = vld [vmem:[%s3123_s1 + $0x10] sm:$0xff]  ;;  %v38_v15 = vld [vmem:[%s3123_s1 + $0x8] sm:$0xff] }
   0x6   :  { %1958 = vmatprep.subr.mxu0 %v1663_v4  ;;  %1982 = vmatprep.subr.mxu1 %v43_v5  ;;  %v1658_v14 = vld [vmem:[%s3123_s1 + $0x50] sm:$0xff] }
   0x7   :  { %1959 = vmatpush3.msra.mxu0 %v1663_v4  ;;  %1983 = vmatpush3.msra.mxu1 %v43_v5 }
   0x8   :  { %1960 = vmatprep.subr.mxu0 %v1662_v6  ;;  %1984 = vmatprep.subr.mxu1 %v42_v7 }
   0x9   :  { %1961 = vmatpush3.msra.mxu0 %v1662_v6  ;;  %1985 = vmatpush3.msra.mxu1 %v42_v7 }
   0xa   :  { %1962 = vmatprep.subr.mxu0 %v1661_v8  ;;  %1986 = vmatprep.subr.mxu1 %v41_v9 }
   0xb   :  { %1963 = vmatpush3.msra.mxu0 %v1661_v8  ;;  %1987 = vmatpush3.msra.mxu1 %v41_v9 }
   0xc   :  { %1964 = vmatprep.subr.mxu0 %v1660_v10  ;;  %1988 = vmatprep.subr.mxu1 %v40_v11 }
   0xd   :  { %1965 = vmatpush3.msra.mxu0 %v1660_v10  ;;  %1989 = vmatpush3.msra.mxu1 %v40_v11 }
   0xe   :  { %1966 = vmatprep.subr.mxu0 %v1659_v12  ;;  %1990 = vmatprep.subr.mxu1 %v39_v13 }
   0xf   :  { %14 = vsyncpa [#allocation4], 0  ;;  %1967 = vmatpush3.msra.mxu0 %v1659_v12  ;;  %1991 = vmatpush3.msra.mxu1 %v39_v13  ;;  %v1657_v16 = vld [vmem:[%s3123_s1 + $0x48] sm:$0xff]  ;;  %v37_v17 = vld [vmem:[%s3123_s1] sm:$0xff]  ;;  %vm60_vm0 = vcmask 588800   ;;  %v393_v51 = vlaneseq  ;;  %vm617_vm1 = vcmask 1041409  }
  0x10   :  { %1968 = vmatprep.subr.mxu0 %v1658_v14  ;;  %1992 = vmatprep.subr.mxu1 %v38_v15  ;;  %v46_v18 = vld [vmem:[%s3122_s0 + $0x1] sm:$0xff]  ;;  %v47_v20 = vld [vmem:[%s3122_s0 + $0x9] sm:$0xff]  ;;  %v48_v23 = vld [vmem:[%s3122_s0 + $0x19] sm:$0xff]  ;;  %v2309_v49 = vmov 1983009808   ;;  %vm619_vm2 = vcmask 1042434  }
  0x11   :  { %1969 = vmatpush3.msra.mxu0 %v1658_v14  ;;  %1993 = vmatpush3.msra.mxu1 %v38_v15  ;;  %v33_v19 = vld [vmem:[%s3122_s0] sm:$0xff]  ;;  %v34_v21 = vld [vmem:[%s3122_s0 + $0x8] sm:$0xff]  ;;  %v1682_v22 = vld [vmem:[%s3123_s1 + $0xd0] sm:$0xff]  ;;  %v391_v50 = vunpack.c.l.s4 %v2309_v49  ;;  %v394_v57 = vshrl.u32 %v393_v51, 7  ;;  %vm621_vm3 = vcmask 1043459   ;;  %vm623_vm4 = vcmask 1044484  }
  0x12   :  { %1970 = vmatprep.subr.mxu0 %v1657_v16  ;;  %1994 = vmatprep.subr.mxu1 %v37_v17  ;;  %v35_v24 = vld [vmem:[%s3122_s0 + $0x18] sm:$0xff]  ;;  %v1681_v25 = vld [vmem:[%s3123_s1 + $0xc8] sm:$0xff]  ;;  %v36_v26 = vld [vmem:[%s3122_s0 + $0x20] sm:$0xff]  ;;  %vm625_vm5 = vcmask 1045509   ;;  %vm627_vm6 = vcmask 1046534   ;;  %vm629_vm7 = vcmask 1047559  }
  0x13   :  { %1971 = vmatpush3.msra.mxu0 %v1657_v16  ;;  %1972 = vmatprep.mubr.msk.f32.mxu0 %vm60_vm0, %v46_v18  ;;  %v1680_v27 = vld [vmem:[%s3123_s1 + $0xc0] sm:$0xff]  ;;  %v1679_v30 = vld [vmem:[%s3123_s1 + $0xb8] sm:$0xff]  ;;  %v1678_v31 = vld [vmem:[%s3123_s1 + $0xb0] sm:$0xff]  ;;  %v392_v56 = vunpack.c.0.s8 %v391_v50  ;;  %s2310_s13 = smov 64   ;;  %vm2312_vm8 = vmmov 0   ;;  %vm1568_vm9 = vcmask 261120  }
  0x14   :  { %1995 = vmatpush3.msra.mxu1 %v37_v17  ;;  %1996 = vmatprep.mubr.msk.f32.mxu1 %vm60_vm0, %v33_v19  ;;  %v49_v28 = vld [vmem:[%s3122_s0 + $0x21] sm:$0xff]  ;;  %v1675_v34 = vld [vmem:[%s3123_s1 + $0x98] sm:$0xff]  ;;  %v1674_v35 = vld [vmem:[%s3123_s1 + $0x90] sm:$0xff]  ;;  %v2517_v17 = vsub.s32 0, %v394_v57  ;;  %s2313_s18 = smov [#allocation3]  }
  0x15   :  { %1973 = vmatmul.mubr.msk.f32.vlgmr.msra.gmra.mxu0 %vm60_vm0, %v47_v20  ;;  %1997 = vmatmul.mubr.msk.f32.vlgmr.msra.gmra.mxu1 %vm60_vm0, %v34_v21  ;;  %v255_v29 = vld [vmem:[%s3122_s0 + $0x2] sm:$0xff]  ;;  %v256_v36 = vld [vmem:[%s3122_s0 + $0xa] sm:$0xff]  ;;  %v257_v37 = vld [vmem:[%s3122_s0 + $0x1a] sm:$0xff]  ;;  %v2514_v2 = vsub.s32 %v392_v56, %v394_v57  ;;  %s1649_s19 = sshll.u32 %s2313_s18, 4  ;;  %s1650_s19 = int_to_ptr.vmem [resolvable:$true] %s1649_s19 }
  0x16   :  { %2002 = vmatprep.subr.mxu0 %v1682_v22  ;;  %1975 = vmatprep.mubr.msk.f32.mxu0 %vm60_vm0, %v48_v23  ;;  %v1677_v32 = vld [vmem:[%s3123_s1 + $0xa8] sm:$0xff]  ;;  %v1676_v33 = vld [vmem:[%s3123_s1 + $0xa0] sm:$0xff]  ;;  %v1719_v39 = vld [vmem:[%s3125_s3 + $0xf8] sm:$0xff]  ;;  %s2287_s20 = scalar_lea.vmem %s1650_s19, 32  ;;  %p2292_p1 = scmp.lt.s32.totalorder %s1650_s19, %s1650_s19 }
  0x17   :  { %2003 = vmatpush3.msra.mxu0 %v1682_v22  ;;  %1999 = vmatprep.mubr.msk.f32.mxu1 %vm60_vm0, %v35_v24  ;;  %v258_v38 = vld [vmem:[%s3122_s0 + $0x22] sm:$0xff]  ;;  %v839_v40 = vld [vmem:[%s3125_s3 + $0x78] sm:$0xff]  ;;  %v1718_v41 = vld [vmem:[%s3125_s3 + $0xf0] sm:$0xff]  ;;  %p2288_p0 = scmp.ne.s32.totalorder %s1650_s19, %s2287_s20  ;;  %p2293_p2 = scmp.lt.s32.totalorder %s2287_s20, %s2287_s20 }
  0x18   :  { %2004 = vmatprep.subr.mxu0 %v1681_v25  ;;  %2026 = vmatprep.subr.mxu1 %v1719_v39  ;;  %v838_v42 = vld [vmem:[%s3125_s3 + $0x70] sm:$0xff]  ;;  %v1717_v43 = vld [vmem:[%s3125_s3 + $0xe8] sm:$0xff]  ;;  %v1687_v59 = vld [vmem:[%s3124_s2] ss:$0 sm:$0xff] }
  0x19   :  { %2005 = vmatpush3.msra.mxu0 %v1681_v25  ;;  %2000 = vmatmul.mubr.msk.f32.gmra.mxu1 %vm60_vm0, %v36_v26  ;;  %v837_v44 = vld [vmem:[%s3125_s3 + $0x68] sm:$0xff]  ;;  %p2294_p3 = por %p2293_p2, %p2292_p1 }
  0x1a   :  { %2006 = vmatprep.subr.mxu0 %v1680_v27  ;;  %1976 = vmatmul.mubr.msk.f32.gmra.mxu0 %vm60_vm0, %v49_v28 }
  0x1b   :  { %2007 = vmatpush3.msra.mxu0 %v1680_v27  ;;  %2020 = vmatprep.mubr.msk.f32.mxu0 %vm60_vm0, %v255_v29  ;;  %p2295_p4 = pnand %p2294_p3, %p2288_p0 }
  0x1c   :  { %2008 = vmatprep.subr.mxu0 %v1679_v30  ;;  %2027 = vmatpush3.msra.mxu1 %v1719_v39 }
  0x1d   :  { %2009 = vmatpush3.msra.mxu0 %v1679_v30  ;;  %2028 = vmatprep.subr.mxu1 %v1718_v41 }
  0x1e   :  { %2010 = vmatprep.subr.mxu0 %v1678_v31  ;;  %2029 = vmatpush3.msra.mxu1 %v1718_v41 }
  0x1f   :  { %2011 = vmatpush3.msra.mxu0 %v1678_v31  ;;  %2030 = vmatprep.subr.mxu1 %v1717_v43 }
  0x20   :  { %2012 = vmatprep.subr.mxu0 %v1677_v32  ;;  %2031 = vmatpush3.msra.mxu1 %v1717_v43 }
  0x21   :  { %2013 = vmatpush3.msra.mxu0 %v1677_v32  ;;  %v1716_v32 = vld [vmem:[%s3125_s3 + $0xe0] sm:$0xff] }
  0x22   :  { %2014 = vmatprep.subr.mxu0 %v1676_v33  ;;  %2032 = vmatprep.subr.mxu1 %v1716_v32 }
  0x23   :  { %2015 = vmatpush3.msra.mxu0 %v1676_v33  ;;  %2033 = vmatpush3.msra.mxu1 %v1716_v32 }
  0x24   :  { %2016 = vmatprep.subr.mxu0 %v1675_v34 }
  0x25   :  { %2017 = vmatpush3.msra.mxu0 %v1675_v34 }
  0x26   :  { %2018 = vmatprep.subr.mxu0 %v1674_v35 }
  0x27   :  { %2019 = vmatpush3.msra.mxu0 %v1674_v35 }
  0x28   :  { %2021 = vmatmul.mubr.msk.f32.vlgmr.msra.gmra.mxu0 %vm60_vm0, %v256_v36  ;;  %2061 = vmatprep.subr.mxu0 %v839_v40 }
  0x29   :  { %2023 = vmatprep.mubr.msk.f32.mxu0 %vm60_vm0, %v257_v37  ;;  %2062 = vmatpush3.msra.mxu0 %v839_v40  ;;  %v1715_v40 = vld [vmem:[%s3125_s3 + $0xd8] sm:$0xff] }
  0x2a   :  { %2063 = vmatprep.subr.mxu0 %v838_v42  ;;  %2034 = vmatprep.subr.mxu1 %v1715_v40 }
  0x2b   :  { %2064 = vmatpush3.msra.mxu0 %v838_v42  ;;  %2035 = vmatpush3.msra.mxu1 %v1715_v40 }
  0x2c   :  { %2024 = vmatmul.mubr.msk.f32.gmra.mxu0 %vm60_vm0, %v258_v38  ;;  %2065 = vmatprep.subr.mxu0 %v837_v44 }
  0x2d   :  { %2066 = vmatpush3.msra.mxu0 %v837_v44 }
  0xd5   :  { %v1974_v45 = vpop.f32.mrf.mxu0  ;;  %v1998_v47 = vpop.f32.mrf.mxu1 }
  0xd6   :  { %v242_v54 = vadd.f32 %v1998_v47, %v1974_v45 }
  0xd7   :  { %v139_v46 = vpop.f32.mrf.mxu0  ;;  %v236_v52 = vpop.f32.mrf.mxu1 }
  0xd8   :  { %v237_v60 = vadd.f32 %v236_v52, %v139_v46 }
  0xd9   :  { %v2001_v55 = vpop.f32.mrf.mxu1 }
  0xda   :  { %v1977_v48 = vpop.f32.mrf.mxu0 }
  0xdb   :  { %v252_v63 = vadd.f32 %v2001_v55, %v1977_v48  ;;  %v246_v0 = vpop.f32.mrf.mxu1 }
  0xdc   :  { %v149_v53 = vpop.f32.mrf.mxu0 }
  0xdd   :  { %v247_v8 = vadd.f32 %v246_v0, %v149_v53  ;;  %v1714_v53 = vld [vmem:[%s3125_s3 + $0xd0] sm:$0xff] }
  0xde   :  { %2036 = vmatprep.subr.mxu1 %v1714_v53 }
  0xdf   :  { %2037 = vmatpush3.msra.mxu1 %v1714_v53 }
  0xe8   :  { %v2022_v58 = vpop.f32.mrf.mxu0 }
  0xe9   :  { %v367_v61 = vadd.f32 %v2022_v58, %v242_v54 }
  0xea   :  { %v347_v62 = vpop.f32.mrf.mxu0 }
  0xeb   :  { %v378_v1 = vadd.f32 %v1687_v59, %v367_v61  ;;  %v366_v3 = vadd.f32 %v347_v62, %v237_v60  ;;  %v1713_v62 = vld [vmem:[%s3125_s3 + $0xc8] sm:$0xff] }
  0xec   :  { %v2025_v4 = vpop.f32.mrf.mxu0  ;;  %2038 = vmatprep.subr.mxu1 %v1713_v62 }
  0xed   :  { %v382_v5 = vmax.f32 %v378_v1, 0.0  ;;  %v377_v6 = vadd.f32 %v1687_v59, %v366_v3  ;;  %v369_v7 = vadd.f32 %v2025_v4, %v252_v63  ;;  %2039 = vmatpush3.msra.mxu1 %v1713_v62  ;;  %v2311_v62 = vmov 0.0  }
  0xee   :  { %v357_v9 = vpop.f32.mrf.mxu0  ;;  %720 = vst [vmem:[#allocation2] sm:$0x1] %v2311_v62  ;;  %721 = vst [vmem:[#allocation2 + $0x10] sm:$0x1] %v2311_v62 }
  0xef   :  { %v406_v10 = vcombine.high %v382_v5, %v382_v5  ;;  %v413_v11 = vrot.slane %v382_v5, %v2514_v2  ;;  %v381_v12 = vmax.f32 %v377_v6, 0.0  ;;  %v380_v13 = vadd.f32 %v1687_v59, %v369_v7  ;;  %722 = vst [vmem:[#allocation2 + $0x9] sm:$0x1] %v2311_v62  ;;  %723 = vst [vmem:[#allocation2 + $0x19] sm:$0x1] %v2311_v62 }
  0xf0   :  { %v368_v14 = vadd.f32 %v357_v9, %v247_v8  ;;  %v836_v8 = vld [vmem:[%s3125_s3 + $0x60] sm:$0xff] }
  0xf1   :  { %v1692_v15 = vrot.slane %v413_v11, 9  ;;  %v389_v16 = vcombine.high %v381_v12, %v381_v12  ;;  %v396_v18 = vrot.slane %v381_v12, %v2514_v2  ;;  %v384_v19 = vmax.f32 %v380_v13, 0.0  ;;  %2067 = vmatprep.subr.mxu0 %v836_v8  ;;  %v1712_v13 = vld [vmem:[%s3125_s3 + $0xc0] sm:$0xff] }
  0xf2   :  { %v379_v20 = vadd.f32 %v1687_v59, %v368_v14  ;;  %v420_v21 = vrot.slane %v406_v10, %v2514_v2  ;;  %v421_v22 = vcombine.high %v413_v11, %v413_v11  ;;  %2068 = vmatpush3.msra.mxu0 %v836_v8  ;;  %2040 = vmatprep.subr.mxu1 %v1712_v13  ;;  %v826_v8 = vld [vmem:[%s3125_s3 + $0x10] sm:$0xff] }
  0xf3   :  { %v2521_v23 = vmax.f32 %v413_v11, %v1692_v15  ;;  %v403_v24 = vrot.slane %v389_v16, %v2514_v2  ;;  %v404_v25 = vcombine.high %v396_v18, %v396_v18  ;;  %v1688_v26 = vrot.slane %v396_v18, 9  ;;  %2041 = vmatpush3.msra.mxu1 %v1712_v13  ;;  %v2694_v13 = vld [vmem:[%s3125_s3 + $0x178] sm:$0xff] }
  0xf4   :  { %v440_v27 = vcombine.high %v384_v19, %v384_v19  ;;  %v447_v28 = vrot.slane %v384_v19, %v2514_v2  ;;  %v383_v31 = vmax.f32 %v379_v20, 0.0  ;;  %v422_v39 = vcombine.high %v420_v21, %v420_v21  ;;  %v835_v19 = vld [vmem:[%s3125_s3 + $0x58] sm:$0xff] }
  0xf5   :  { %v405_v29 = vcombine.high %v403_v24, %v403_v24  ;;  %v1690_v30 = vrot.slane %v403_v24, 9  ;;  %v1689_v33 = vrot.slane %v404_v25, 9  ;;  %v2528_v34 = vmax.f32 %v396_v18, %v1688_v26  ;;  %2069 = vmatprep.subr.mxu0 %v835_v19 }
  0xf6   :  { %v2531_v35 = vrot.slane %v440_v27, %v2514_v2  ;;  %v455_v36 = vcombine.high %v447_v28, %v447_v28  ;;  %v423_v38 = vcombine.high %v383_v31, %v383_v31  ;;  %v1693_v41 = vrot.slane %v421_v22, 9  ;;  %2070 = vmatpush3.msra.mxu0 %v835_v19 }
  0xf7   :  { %v1691_v37 = vrot.slane %v405_v29, 9  ;;  %v572_v42 = vrot.slane %v2521_v23, %v2517_v17  ;;  %v2538_v43 = vmax.f32 %v404_v25, %v1689_v33  ;;  %v2540_v44 = vmax.f32 %v403_v24, %v1690_v30  ;;  %v1711_v25 = vld [vmem:[%s3125_s3 + $0xb8] sm:$0xff] }
  0xf8   :  { %v556_v46 = vrot.slane %v2528_v34, %v2517_v17  ;;  %v1700_v47 = vrot.slane %v447_v28, 9  ;;  %v430_v48 = vrot.slane %v383_v31, %v2514_v2  ;;  %v1701_v49 = vrot.slane %v455_v36, 9  ;;  %2042 = vmatprep.subr.mxu1 %v1711_v25 }
  0xf9   :  { %v2542_v45 = vmax.f32 %v405_v29, %v1691_v37  ;;  %v1702_v50 = vrot.slane %v2531_v35, 9  ;;  %v437_v51 = vrot.slane %v423_v38, %v2514_v2  ;;  %v1694_v52 = vrot.slane %v420_v21, 9  ;;  %2043 = vmatpush3.msra.mxu1 %v1711_v25 }
  0xfa   :  { %v560_v54 = vrot.slane %v2538_v43, %v2517_v17  ;;  %v438_v55 = vcombine.high %v430_v48, %v430_v48  ;;  %v1696_v56 = vrot.slane %v430_v48, 9  ;;  %v1695_v57 = vrot.slane %v422_v39, 9 }
  0xfb   :  { %v564_v58 = vrot.slane %v2540_v44, %v2517_v17  ;;  %v439_v59 = vcombine.high %v437_v51, %v437_v51  ;;  %v1698_v60 = vrot.slane %v437_v51, 9  ;;  %v2556_v61 = vmax.f32 %v421_v22, %v1693_v41 }
  0xfc   :  { %v1697_v63 = vrot.slane %v438_v55, 9  ;;  %v2561_v0 = vmax.f32 %v430_v48, %v1696_v56  ;;  %v2563_v1 = vmax.f32 %v420_v21, %v1694_v52  ;;  %v568_v3 = vrot.slane %v2542_v45, %v2517_v17  ;;  %v832_v52 = vld [vmem:[%s3125_s3 + $0x40] sm:$0xff] }
  0xfd   :  { %v2567_v4 = vmax.f32 %v447_v28, %v1700_v47  ;;  %v2569_v5 = vmax.f32 %v455_v36, %v1701_v49  ;;  %v1699_v6 = vrot.slane %v439_v59, 9  ;;  %v2571_v7 = vmax.f32 %v437_v51, %v1698_v60  ;;  %v1709_v49 = vld [vmem:[%s3125_s3 + $0xa8] sm:$0xff]  ;;  %v1708_v56 = vld [vmem:[%s3125_s3 + $0xa0] sm:$0xff]  ;;  %v1706_v60 = vld [vmem:[%s3125_s3 + $0x90] sm:$0xff] }
  0xfe   :  { %v2576_v9 = vmax.f32 %v438_v55, %v1697_v63  ;;  %v2578_v10 = vmax.f32 %v422_v39, %v1695_v57  ;;  %v576_v11 = vrot.slane %v2556_v61, %v2517_v17  ;;  %v618_v12 = vsel %vm617_vm1, %v560_v54, %v556_v46  ;;  %v1710_v39 = vld [vmem:[%s3125_s3 + $0xb0] sm:$0xff]  ;;  %v833_v46 = vld [vmem:[%s3125_s3 + $0x48] sm:$0xff]  ;;  %v831_v55 = vld [vmem:[%s3125_s3 + $0x38] sm:$0xff] }
  0xff   :  { %v2586_v14 = vmax.f32 %v439_v59, %v1699_v6  ;;  %v596_v15 = vrot.slane %v2571_v7, %v2517_v17  ;;  %v620_v16 = vsel %vm619_vm2, %v564_v58, %v618_v12  ;;  %v456_v18 = vcombine.high %v2531_v35, %v2531_v35  ;;  %2044 = vmatprep.subr.mxu1 %v1710_v39  ;;  %v830_v57 = vld [vmem:[%s3125_s3 + $0x30] sm:$0xff]  ;;  %v1707_v58 = vld [vmem:[%s3125_s3 + $0x98] sm:$0xff]  ;;  %v829_v59 = vld [vmem:[%s3125_s3 + $0x28] sm:$0xff] }
 0x100   :  { %v588_v20 = vrot.slane %v2561_v0, %v2517_v17  ;;  %v592_v21 = vrot.slane %v2576_v9, %v2517_v17  ;;  %v580_v22 = vrot.slane %v2563_v1, %v2517_v17  ;;  %v622_v24 = vsel %vm621_vm3, %v568_v3, %v620_v16  ;;  %2045 = vmatpush3.msra.mxu1 %v1710_v39  ;;  %v828_v63 = vld [vmem:[%s3125_s3 + $0x20] sm:$0xff]  ;;  %v1705_v3 = vld [vmem:[%s3125_s3 + $0x88] sm:$0xff]  ;;  %v827_v6 = vld [vmem:[%s3125_s3 + $0x18] sm:$0xff] }
 0x101   :  { %v624_v26 = vsel %vm623_vm4, %v572_v42, %v622_v24  ;;  %v1703_v27 = vrot.slane %v456_v18, 9  ;;  %v2608_v28 = vmax.f32 %v2531_v35, %v1702_v50  ;;  %v600_v29 = vrot.slane %v2586_v14, %v2517_v17  ;;  %v834_v35 = vld [vmem:[%s3125_s3 + $0x50] sm:$0xff]  ;;  %2046 = vmatprep.subr.mxu1 %v1709_v49  ;;  %v825_v12 = vld [vmem:[%s3125_s3 + $0x8] sm:$0xff] }
 0x102   :  { %v604_v30 = vrot.slane %v2567_v4, %v2517_v17  ;;  %v584_v31 = vrot.slane %v2578_v10, %v2517_v17  ;;  %v626_v32 = vsel %vm625_vm5, %v576_v11, %v624_v26  ;;  %v631_v33 = vsel %vm617_vm1, %v592_v21, %v588_v20  ;;  %2071 = vmatprep.subr.mxu0 %v834_v35  ;;  %v1704_v11 = vld [vmem:[%s3125_s3 + $0x80] sm:$0xff] }
 0x103   :  { %v628_v36 = vsel %vm627_vm6, %v580_v22, %v626_v32  ;;  %v2622_v37 = vmax.f32 %v456_v18, %v1703_v27  ;;  %v632_v38 = vsel %vm619_vm2, %v596_v15, %v631_v33  ;;  %v608_v41 = vrot.slane %v2569_v5, %v2517_v17  ;;  %2072 = vmatpush3.msra.mxu0 %v834_v35  ;;  %v824_v15 = vld [vmem:[%s3125_s3] sm:$0xff] }
 0x104   :  { %v630_v40 = vsel %vm629_vm7, %v584_v31, %v628_v36  ;;  %v633_v42 = vsel %vm621_vm3, %v600_v29, %v632_v38  ;;  %v612_v47 = vrot.slane %v2608_v28, %v2517_v17  ;;  %2073 = vmatprep.subr.mxu0 %v833_v46  ;;  %2047 = vmatpush3.msra.mxu1 %v1709_v49 }
 0x105   :  { %640 = vrot.lane.b32.xlu0 %v630_v40, %s2310_s13  ;;  %v634_v48 = vsel %vm623_vm4, %v604_v30, %v633_v42  ;;  %v616_v50 = vrot.slane %v2622_v37, %v2517_v17  ;;  %2074 = vmatpush3.msra.mxu0 %v833_v46 }
 0x106   :  { %v635_v51 = vsel %vm625_vm5, %v608_v41, %v634_v48  ;;  %2075 = vmatprep.subr.mxu0 %v832_v52  ;;  %2048 = vmatprep.subr.mxu1 %v1708_v56 }
 0x107   :  { %v636_v53 = vsel %vm627_vm6, %v612_v47, %v635_v51  ;;  %2076 = vmatpush3.msra.mxu0 %v832_v52  ;;  %2049 = vmatpush3.msra.mxu1 %v1708_v56 }
 0x108   :  { %v637_v54 = vsel %vm629_vm7, %v616_v50, %v636_v53  ;;  %2077 = vmatprep.subr.mxu0 %v831_v55  ;;  %2050 = vmatprep.subr.mxu1 %v1707_v58 }
 0x109   :  { %642 = vrot.lane.b32.xlu0 %v637_v54, %s2310_s13  ;;  %2078 = vmatpush3.msra.mxu0 %v831_v55 }
 0x10a   :  { %2079 = vmatprep.subr.mxu0 %v830_v57  ;;  %2051 = vmatpush3.msra.mxu1 %v1707_v58 }
 0x10b   :  { %2080 = vmatpush3.msra.mxu0 %v830_v57  ;;  %2052 = vmatprep.subr.mxu1 %v1706_v60 }
 0x10c   :  { %2081 = vmatprep.subr.mxu0 %v829_v59  ;;  %2053 = vmatpush3.msra.mxu1 %v1706_v60 }
 0x10d   :  { %2082 = vmatpush3.msra.mxu0 %v829_v59  ;;  %2054 = vmatprep.subr.mxu1 %v1705_v3 }
 0x10e   :  { %2083 = vmatprep.subr.mxu0 %v828_v63  ;;  %2055 = vmatpush3.msra.mxu1 %v1705_v3 }
 0x10f   :  { %2084 = vmatpush3.msra.mxu0 %v828_v63  ;;  %2056 = vmatprep.subr.mxu1 %v1704_v11 }
 0x110   :  { %2085 = vmatprep.subr.mxu0 %v827_v6  ;;  %2057 = vmatpush3.msra.mxu1 %v1704_v11 }
 0x111   :  { %2086 = vmatpush3.msra.mxu0 %v827_v6  ;;  %2096 = vmatprep.subr.mxu1 %v2694_v13 }
 0x112   :  { %2087 = vmatprep.subr.mxu0 %v826_v8 }
 0x113   :  { %2088 = vmatpush3.msra.mxu0 %v826_v8 }
 0x114   :  { %2089 = vmatprep.subr.mxu0 %v825_v12 }
 0x115   :  { %2090 = vmatpush3.msra.mxu0 %v825_v12 }
 0x116   :  { %2091 = vmatprep.subr.mxu0 %v824_v15 }
 0x117   :  { %2092 = vmatpush3.msra.mxu0 %v824_v15 }
 0x118   :  { %2131 = vmatprep.subr.mxu0 %v2311_v62 }
 0x177   :  { %v641_v16 = vpop.permute.xlu0 %640 }
 0x178   :  { %v646_v18 = vcombine.high %v641_v16, %v641_v16  ;;  %v653_v19 = vrot.slane %v641_v16, %v2514_v2 }
 0x17a   :  { %v660_v20 = vrot.slane %v646_v18, %v2514_v2  ;;  %v661_v21 = vcombine.high %v653_v19, %v653_v19  ;;  %v680_v22 = vrot.slane %v653_v19, 1  ;;  %v704_v24 = vmax.f32 %v2528_v34, %v653_v19 }
 0x17b   :  { %v643_v25 = vpop.permute.xlu0 %642 }
 0x17c   :  { %v662_v26 = vcombine.high %v660_v20, %v660_v20  ;;  %v681_v27 = vrot.slane %v661_v21, 1  ;;  %v682_v29 = vrot.slane %v660_v20, 1  ;;  %v705_v30 = vmax.f32 %v2538_v43, %v680_v22  ;;  %v1734_v22 = vld [vmem:[%s3125_s3 + $0x170] sm:$0xff] }
 0x17d   :  { %v706_v31 = vmax.f32 %v2540_v44, %v661_v21  ;;  %v708_v32 = vmax.f32 %v2521_v23, %v660_v20  ;;  %v663_v33 = vcombine.high %v643_v25, %v643_v25  ;;  %v743_v34 = vrot.slane %v704_v24, %v2517_v17 }
 0x17e   :  { %v683_v35 = vrot.slane %v662_v26, 1  ;;  %v707_v36 = vmax.f32 %v2542_v45, %v681_v27  ;;  %v709_v38 = vmax.f32 %v2556_v61, %v682_v29  ;;  %v710_v39 = vmax.f32 %v2563_v1, %v662_v26  ;;  %v1732_v26 = vld [vmem:[%s3125_s3 + $0x160] sm:$0xff]  ;;  %v1731_v27 = vld [vmem:[%s3125_s3 + $0x158] sm:$0xff] }
 0x17f   :  { %v747_v40 = vrot.slane %v705_v30, %v2517_v17  ;;  %v751_v41 = vrot.slane %v706_v31, %v2517_v17  ;;  %v670_v43 = vrot.slane %v643_v25, %v2514_v2  ;;  %v759_v42 = vrot.slane %v708_v32, %v2517_v17  ;;  %v1729_v30 = vld [vmem:[%s3125_s3 + $0x148] sm:$0xff]  ;;  %v1728_v31 = vld [vmem:[%s3125_s3 + $0x140] sm:$0xff]  ;;  %v1727_v32 = vld [vmem:[%s3125_s3 + $0x138] sm:$0xff] }
 0x180   :  { %v711_v44 = vmax.f32 %v2578_v10, %v683_v35  ;;  %v755_v23 = vrot.slane %v707_v36, %v2517_v17  ;;  %v677_v61 = vrot.slane %v663_v33, %v2514_v2  ;;  %v763_v47 = vrot.slane %v709_v38, %v2517_v17  ;;  %v1726_v33 = vld [vmem:[%s3125_s3 + $0x130] sm:$0xff]  ;;  %v1725_v35 = vld [vmem:[%s3125_s3 + $0x128] sm:$0xff]  ;;  %v1724_v36 = vld [vmem:[%s3125_s3 + $0x120] sm:$0xff] }
 0x181   :  { %v804_v45 = vsel %vm617_vm1, %v747_v40, %v743_v34  ;;  %v678_v46 = vcombine.high %v670_v43, %v670_v43  ;;  %v684_v1 = vrot.slane %v670_v43, 1  ;;  %v767_v48 = vrot.slane %v710_v39, %v2517_v17  ;;  %v1723_v38 = vld [vmem:[%s3125_s3 + $0x118] sm:$0xff]  ;;  %v1722_v39 = vld [vmem:[%s3125_s3 + $0x110] sm:$0xff]  ;;  %v1721_v34 = vld [vmem:[%s3125_s3 + $0x108] sm:$0xff] }
 0x182   :  { %v805_v49 = vsel %vm619_vm2, %v751_v41, %v804_v45  ;;  %v712_v50 = vmax.f32 %v2561_v0, %v670_v43  ;;  %v679_v51 = vcombine.high %v677_v61, %v677_v61  ;;  %v686_v53 = vrot.slane %v677_v61, 1  ;;  %v1720_v40 = vld [vmem:[%s3125_s3 + $0x100] sm:$0xff]  ;;  %v1752_v43 = vld [vmem:[%s3127_s5 + $0xf8] sm:$0xff]  ;;  %v1750_v45 = vld [vmem:[%s3127_s5 + $0xe8] sm:$0xff] }
 0x183   :  { %v806_v10 = vsel %vm621_vm3, %v755_v23, %v805_v49  ;;  %v685_v52 = vrot.slane %v678_v46, 1  ;;  %v771_v54 = vrot.slane %v711_v44, %v2517_v17  ;;  %v713_v2 = vmax.f32 %v2576_v9, %v684_v1  ;;  %v1751_v44 = vld [vmem:[%s3127_s5 + $0xf0] sm:$0xff]  ;;  %v1152_v23 = vld [vmem:[%s3127_s5 + $0x78] sm:$0xff]  ;;  %v1149_v1 = vld [vmem:[%s3127_s5 + $0x60] sm:$0xff] }
 0x184   :  { %v807_v55 = vsel %vm623_vm4, %v759_v42, %v806_v10  ;;  %v714_v56 = vmax.f32 %v2571_v7, %v678_v46  ;;  %v687_v58 = vrot.slane %v679_v51, 1  ;;  %v716_v0 = vmax.f32 %v2567_v4, %v677_v61  ;;  %v1151_v42 = vld [vmem:[%s3127_s5 + $0x70] sm:$0xff]  ;;  %v1150_v61 = vld [vmem:[%s3127_s5 + $0x68] sm:$0xff]  ;;  %v1749_v46 = vld [vmem:[%s3127_s5 + $0xe0] sm:$0xff] }
 0x185   :  { %v808_v57 = vsel %vm625_vm5, %v763_v47, %v807_v55  ;;  %v715_v59 = vmax.f32 %v2586_v14, %v685_v52  ;;  %v717_v63 = vmax.f32 %v2569_v5, %v686_v53  ;;  %v775_v3 = vrot.slane %v712_v50, %v2517_v17  ;;  %v1748_v47 = vld [vmem:[%s3127_s5 + $0xd8] sm:$0xff]  ;;  %v1747_v49 = vld [vmem:[%s3127_s5 + $0xd0] sm:$0xff]  ;;  %v1746_v10 = vld [vmem:[%s3127_s5 + $0xc8] sm:$0xff] }
 0x186   :  { %v809_v60 = vsel %vm627_vm6, %v767_v48, %v808_v57  ;;  %v779_v6 = vrot.slane %v713_v2, %v2517_v17  ;;  %v718_v9 = vmax.f32 %v2608_v28, %v679_v51  ;;  %v783_v7 = vrot.slane %v714_v56, %v2517_v17  ;;  %v1148_v48 = vld [vmem:[%s3127_s5 + $0x58] sm:$0xff]  ;;  %v1147_v50 = vld [vmem:[%s3127_s5 + $0x50] sm:$0xff]  ;;  %v1146_v51 = vld [vmem:[%s3127_s5 + $0x48] sm:$0xff] }
 0x187   :  { %v810_v8 = vsel %vm629_vm7, %v771_v54, %v809_v60  ;;  %v787_v11 = vrot.slane %v715_v59, %v2517_v17  ;;  %v719_v14 = vmax.f32 %v2622_v37, %v687_v58  ;;  %v791_v5 = vrot.slane %v716_v0, %v2517_v17  ;;  %v1745_v52 = vld [vmem:[%s3127_s5 + $0xc0] sm:$0xff]  ;;  %v1744_v54 = vld [vmem:[%s3127_s5 + $0xb8] sm:$0xff]  ;;  %v1743_v2 = vld [vmem:[%s3127_s5 + $0xb0] sm:$0xff] }
 0x188   :  { %820 = vst [vmem:[#allocation2 + $0x1] sm:$0xff] %v810_v8  ;;  %v811_v4 = vsel %vm617_vm1, %v779_v6, %v775_v3  ;;  %2058 = vmatprep.mubr.f32.mxu1 %v810_v8  ;;  %v795_v15 = vrot.slane %v717_v63, %v2517_v17  ;;  %v799_v28 = vrot.slane %v718_v9, %v2517_v17  ;;  %v1145_v53 = vld [vmem:[%s3127_s5 + $0x40] sm:$0xff]  ;;  %v1144_v55 = vld [vmem:[%s3127_s5 + $0x38] sm:$0xff]  ;;  %v1143_v56 = vld [vmem:[%s3127_s5 + $0x30] sm:$0xff] }
 0x189   :  { %v812_v12 = vsel %vm619_vm2, %v783_v7, %v811_v4  ;;  %v803_v19 = vrot.slane %v719_v14, %v2517_v17  ;;  %v1733_v17 = vld [vmem:[%s3125_s3 + $0x168] sm:$0xff]  ;;  %v1741_v59 = vld [vmem:[%s3127_s5 + $0xa0] sm:$0xff]  ;;  %v1740_v0 = vld [vmem:[%s3127_s5 + $0x98] sm:$0xff] }
 0x18a   :  { %v813_v16 = vsel %vm621_vm3, %v787_v11, %v812_v12  ;;  %v1742_v57 = vld [vmem:[%s3127_s5 + $0xa8] sm:$0xff]  ;;  %v1736_v7 = vld [vmem:[%s3126_s4] ss:$0 sm:$0xff] }
 0x18b   :  { %v814_v18 = vsel %vm623_vm4, %v791_v5, %v813_v16  ;;  %v1142_v58 = vld [vmem:[%s3127_s5 + $0x28] sm:$0xff]  ;;  %v1141_v16 = vld [vmem:[%s3127_s5 + $0x20] sm:$0xff] }
 0x18c   :  { %v815_v20 = vsel %vm625_vm5, %v795_v15, %v814_v18  ;;  %v1739_v15 = vld [vmem:[%s3127_s5 + $0x90] sm:$0xff] }
 0x18d   :  { %v816_v37 = vsel %vm627_vm6, %v799_v28, %v815_v20  ;;  %v1140_v20 = vld [vmem:[%s3127_s5 + $0x18] sm:$0xff] }
 0x18e   :  { %v817_v21 = vsel %vm629_vm7, %v803_v19, %v816_v37  ;;  %v1738_v19 = vld [vmem:[%s3127_s5 + $0x88] sm:$0xff] }
 0x18f   :  { %821 = vst [vmem:[#allocation2 + $0x11] sm:$0xff] %v817_v21  ;;  %v822_v24 = vld [vmem:[#allocation2] sm:$0xff]  ;;  %2059 = vmatmul.mubr.f32.vlgmr.msra.gmra.mxu1 %v817_v21 }
 0x190   :  { %v1009_v25 = vld [vmem:[#allocation2 + $0x2] sm:$0xff]  ;;  %2093 = vmatprep.mubr.f32.mxu0 %v822_v24  ;;  %2097 = vmatpush3.msra.mxu1 %v2694_v13  ;;  %v1730_v13 = vld [vmem:[%s3125_s3 + $0x150] sm:$0xff] }
 0x191   :  { %2098 = vmatprep.subr.mxu1 %v1734_v22  ;;  %2128 = vmatprep.mubr.f32.mxu1 %v1009_v25  ;;  %v1139_v24 = vld [vmem:[%s3127_s5 + $0x10] sm:$0xff] }
 0x192   :  { %2099 = vmatpush3.msra.mxu1 %v1734_v22  ;;  %v1737_v22 = vld [vmem:[%s3127_s5 + $0x80] sm:$0xff] }
 0x193   :  { %2100 = vmatprep.subr.mxu1 %v1733_v17 }
 0x194   :  { %2101 = vmatpush3.msra.mxu1 %v1733_v17 }
 0x195   :  { %2102 = vmatprep.subr.mxu1 %v1732_v26 }
 0x196   :  { %v823_v29 = vld [vmem:[#allocation2 + $0x10] sm:$0xff]  ;;  %2103 = vmatpush3.msra.mxu1 %v1732_v26  ;;  %v1138_v26 = vld [vmem:[%s3127_s5 + $0x8] sm:$0xff] }
 0x197   :  { %2094 = vmatmul.mubr.f32.vlgmr.msra.gmra.mxu0 %v823_v29  ;;  %2104 = vmatprep.subr.mxu1 %v1731_v27  ;;  %v1010_v41 = vld [vmem:[#allocation2 + $0x12] sm:$0xff]  ;;  %v1137_v29 = vld [vmem:[%s3127_s5] sm:$0xff] }
 0x198   :  { %2105 = vmatpush3.msra.mxu1 %v1731_v27  ;;  %2132 = vmatpush3.msra.mxu0 %v1752_v43 }
 0x199   :  { %2106 = vmatprep.subr.mxu1 %v1730_v13  ;;  %2133 = vmatprep.subr.mxu0 %v2311_v62 }
 0x19a   :  { %2107 = vmatpush3.msra.mxu1 %v1730_v13  ;;  %2134 = vmatpush3.msra.mxu0 %v1751_v44 }
 0x19b   :  { %2108 = vmatprep.subr.mxu1 %v1729_v30  ;;  %2135 = vmatprep.subr.mxu0 %v2311_v62 }
 0x19c   :  { %2109 = vmatpush3.msra.mxu1 %v1729_v30  ;;  %2136 = vmatpush3.msra.mxu0 %v1750_v45 }
 0x19d   :  { %2110 = vmatprep.subr.mxu1 %v1728_v31  ;;  %2137 = vmatprep.subr.mxu0 %v2311_v62 }
 0x19e   :  { %2111 = vmatpush3.msra.mxu1 %v1728_v31  ;;  %2138 = vmatpush3.msra.mxu0 %v1749_v46 }
 0x19f   :  { %2112 = vmatprep.subr.mxu1 %v1727_v32  ;;  %2139 = vmatprep.subr.mxu0 %v2311_v62 }
 0x1a0   :  { %2113 = vmatpush3.msra.mxu1 %v1727_v32  ;;  %2140 = vmatpush3.msra.mxu0 %v1748_v47  ;;  %v1768_v47 = vld [vmem:[%s3127_s5 + $0x178] sm:$0xff] }
 0x1a1   :  { %2114 = vmatprep.subr.mxu1 %v1726_v33  ;;  %2141 = vmatprep.subr.mxu0 %v2311_v62 }
 0x1a2   :  { %2115 = vmatpush3.msra.mxu1 %v1726_v33  ;;  %2142 = vmatpush3.msra.mxu0 %v1747_v49 }
 0x1a3   :  { %2116 = vmatprep.subr.mxu1 %v1725_v35  ;;  %2143 = vmatprep.subr.mxu0 %v2311_v62 }
 0x1a4   :  { %2117 = vmatpush3.msra.mxu1 %v1725_v35  ;;  %2144 = vmatpush3.msra.mxu0 %v1746_v10 }
 0x1a5   :  { %2118 = vmatprep.subr.mxu1 %v1724_v36  ;;  %2145 = vmatprep.subr.mxu0 %v2311_v62 }
 0x1a6   :  { %2119 = vmatpush3.msra.mxu1 %v1724_v36  ;;  %2146 = vmatpush3.msra.mxu0 %v1745_v52  ;;  %v1766_v52 = vld [vmem:[%s3127_s5 + $0x168] sm:$0xff] }
 0x1a7   :  { %2120 = vmatprep.subr.mxu1 %v1723_v38  ;;  %2147 = vmatprep.subr.mxu0 %v2311_v62 }
 0x1a8   :  { %2121 = vmatpush3.msra.mxu1 %v1723_v38  ;;  %2148 = vmatpush3.msra.mxu0 %v1744_v54 }
 0x1a9   :  { %2122 = vmatprep.subr.mxu1 %v1722_v39  ;;  %2149 = vmatprep.subr.mxu0 %v2311_v62 }
 0x1aa   :  { %2123 = vmatpush3.msra.mxu1 %v1722_v39  ;;  %2150 = vmatpush3.msra.mxu0 %v1743_v2  ;;  %v1783_v2 = vld [vmem:[%s3127_s5 + $0x1f0] sm:$0xff] }
 0x1ab   :  { %2124 = vmatprep.subr.mxu1 %v1721_v34  ;;  %2151 = vmatprep.subr.mxu0 %v2311_v62 }
 0x1ac   :  { %2125 = vmatpush3.msra.mxu1 %v1721_v34  ;;  %2152 = vmatpush3.msra.mxu0 %v1742_v57  ;;  %v1782_v57 = vld [vmem:[%s3127_s5 + $0x1e8] sm:$0xff] }
 0x1ad   :  { %2126 = vmatprep.subr.mxu1 %v1720_v40  ;;  %2153 = vmatprep.subr.mxu0 %v2311_v62 }
 0x1ae   :  { %2127 = vmatpush3.msra.mxu1 %v1720_v40  ;;  %2154 = vmatpush3.msra.mxu0 %v1741_v59  ;;  %v1781_v59 = vld [vmem:[%s3127_s5 + $0x1e0] sm:$0xff] }
 0x1af   :  { %2129 = vmatmul.mubr.f32.vlgmr.msra.gmra.mxu1 %v1010_v41  ;;  %2166 = vmatprep.subr.mxu1 %v2311_v62 }
 0x1b0   :  { %2167 = vmatpush3.msra.mxu1 %v1152_v23  ;;  %2155 = vmatprep.subr.mxu0 %v2311_v62 }
 0x1b1   :  { %2168 = vmatprep.subr.mxu1 %v2311_v62  ;;  %2156 = vmatpush3.msra.mxu0 %v1740_v0  ;;  %v1762_v0 = vld [vmem:[%s3127_s5 + $0x148] sm:$0xff] }
 0x1b2   :  { %2169 = vmatpush3.msra.mxu1 %v1151_v42  ;;  %2157 = vmatprep.subr.mxu0 %v2311_v62 }
 0x1b3   :  { %2170 = vmatprep.subr.mxu1 %v2311_v62  ;;  %2158 = vmatpush3.msra.mxu0 %v1739_v15  ;;  %v1757_v15 = vld [vmem:[%s3127_s5 + $0x120] sm:$0xff] }
 0x1b4   :  { %2171 = vmatpush3.msra.mxu1 %v1150_v61  ;;  %2159 = vmatprep.subr.mxu0 %v2311_v62 }
 0x1b5   :  { %2172 = vmatprep.subr.mxu1 %v2311_v62  ;;  %2160 = vmatpush3.msra.mxu0 %v1738_v19 }
 0x1b6   :  { %2173 = vmatpush3.msra.mxu1 %v1149_v1  ;;  %2161 = vmatprep.subr.mxu0 %v2311_v62 }
 0x1b7   :  { %2174 = vmatprep.subr.mxu1 %v2311_v62  ;;  %2162 = vmatpush3.msra.mxu0 %v1737_v22 }
 0x1b8   :  { %2175 = vmatpush3.msra.mxu1 %v1148_v48  ;;  %2163 = vmatprep.mubr.msk.f32.mxu0 %vm2312_vm8, %v2311_v62 }
 0x1b9   :  { %2176 = vmatprep.subr.mxu1 %v2311_v62  ;;  %2201 = vmatprep.subr.mxu0 %v2311_v62 }
 0x1ba   :  { %2177 = vmatpush3.msra.mxu1 %v1147_v50  ;;  %2198 = vmatprep.mubr.msk.f32.mxu1 %vm2312_vm8, %v2311_v62  ;;  %v1767_v50 = vld [vmem:[%s3127_s5 + $0x170] sm:$0xff] }
 0x1bb   :  { %2178 = vmatprep.subr.mxu1 %v2311_v62 }
 0x1bc   :  { %2179 = vmatpush3.msra.mxu1 %v1146_v51 }
 0x1bd   :  { %2180 = vmatprep.subr.mxu1 %v2311_v62 }
 0x1be   :  { %2181 = vmatpush3.msra.mxu1 %v1145_v53  ;;  %v1784_v53 = vld [vmem:[%s3127_s5 + $0x1f8] sm:$0xff] }
 0x1bf   :  { %2182 = vmatprep.subr.mxu1 %v2311_v62 }
 0x1c0   :  { %2183 = vmatpush3.msra.mxu1 %v1144_v55  ;;  %v1765_v55 = vld [vmem:[%s3127_s5 + $0x160] sm:$0xff] }
 0x1c1   :  { %2184 = vmatprep.subr.mxu1 %v2311_v62 }
 0x1c2   :  { %2185 = vmatpush3.msra.mxu1 %v1143_v56  ;;  %v1764_v56 = vld [vmem:[%s3127_s5 + $0x158] sm:$0xff] }
 0x1c3   :  { %2186 = vmatprep.subr.mxu1 %v2311_v62 }
 0x1c4   :  { %2187 = vmatpush3.msra.mxu1 %v1142_v58  ;;  %v1763_v58 = vld [vmem:[%s3127_s5 + $0x150] sm:$0xff] }
 0x1c5   :  { %2188 = vmatprep.subr.mxu1 %v2311_v62 }
 0x1c6   :  { %2189 = vmatpush3.msra.mxu1 %v1141_v16 }
 0x1c7   :  { %2190 = vmatprep.subr.mxu1 %v2311_v62 }
 0x1c8   :  { %2191 = vmatpush3.msra.mxu1 %v1140_v20 }
 0x1c9   :  { %2192 = vmatprep.subr.mxu1 %v2311_v62 }
 0x1ca   :  { %2193 = vmatpush3.msra.mxu1 %v1139_v24  ;;  %v1755_v24 = vld [vmem:[%s3127_s5 + $0x110] sm:$0xff] }
 0x1cb   :  { %2194 = vmatprep.subr.mxu1 %v2311_v62 }
 0x1cc   :  { %2195 = vmatpush3.msra.mxu1 %v1138_v26  ;;  %v1754_v26 = vld [vmem:[%s3127_s5 + $0x108] sm:$0xff] }
 0x1cd   :  { %2196 = vmatprep.subr.mxu1 %v2311_v62 }
 0x1ce   :  { %2197 = vmatpush3.msra.mxu1 %v1137_v29 }
 0x1cf   :  { %2236 = vmatprep.subr.mxu1 %v2311_v62 }
 0x24f   :  { %v2060_v60 = vpop.f32.mrf.mxu1 }
 0x251   :  { %v925_v3 = vpop.f32.mrf.mxu1 }
 0x257   :  { %v2095_v63 = vpop.f32.mrf.mxu0 }
 0x258   :  { %v1006_v8 = vadd.f32 %v2095_v63, %v2060_v60  ;;  %v1780_v60 = vld [vmem:[%s3127_s5 + $0x1d8] sm:$0xff]  ;;  %v1761_v63 = vld [vmem:[%s3127_s5 + $0x140] sm:$0xff] }
 0x259   :  { %v1000_v6 = vpop.f32.mrf.mxu0 }
 0x25a   :  { %v1001_v11 = vadd.f32 %v1000_v6, %v925_v3  ;;  %v1779_v3 = vld [vmem:[%s3127_s5 + $0x1d0] sm:$0xff]  ;;  %v1760_v6 = vld [vmem:[%s3127_s5 + $0x138] sm:$0xff] }
 0x26f   :  { %v2130_v9 = vpop.f32.mrf.mxu1 }
 0x270   :  { %v1104_v14 = vadd.f32 %v2130_v9, %v1006_v8  ;;  %v1778_v8 = vld [vmem:[%s3127_s5 + $0x1c8] sm:$0xff] }
 0x271   :  { %v1094_v4 = vpop.f32.mrf.mxu1 }
 0x272   :  { %v1113_v5 = vadd.f32 %v1736_v7, %v1104_v14  ;;  %v1103_v12 = vadd.f32 %v1094_v4, %v1001_v11  ;;  %v1777_v11 = vld [vmem:[%s3127_s5 + $0x1c0] sm:$0xff]  ;;  %v1758_v14 = vld [vmem:[%s3127_s5 + $0x128] sm:$0xff] }
 0x274   :  { %v1115_v28 = vmax.f32 %v1113_v5, 0.0  ;;  %v1112_v18 = vadd.f32 %v1736_v7, %v1103_v12  ;;  %v1759_v7 = vld [vmem:[%s3127_s5 + $0x130] sm:$0xff]  ;;  %v1776_v12 = vld [vmem:[%s3127_s5 + $0x1b8] sm:$0xff] }
 0x276   :  { %v1119_v37 = vrot.slane %v1115_v28, 1  ;;  %v1114_v21 = vmax.f32 %v1112_v18, 0.0  ;;  %v1756_v18 = vld [vmem:[%s3127_s5 + $0x118] sm:$0xff] }
 0x278   :  { %v2919_v25 = vmax.f32 %v1115_v28, %v1119_v37  ;;  %v1118_v17 = vrot.slane %v1114_v21, 1  ;;  %v1775_v28 = vld [vmem:[%s3127_s5 + $0x1b0] sm:$0xff]  ;;  %v1774_v37 = vld [vmem:[%s3127_s5 + $0x1a8] sm:$0xff] }
 0x27a   :  { %v2927_v27 = vmax.f32 %v1114_v21, %v1118_v17  ;;  %v1335_v30 = vrot.slane %v2919_v25, 3  ;;  %v1154_v32 = vrot.slane %v2919_v25, 1  ;;  %v1126_v36 = vrot.slane %v2919_v25, 7  ;;  %v1773_v17 = vld [vmem:[%s3127_s5 + $0x1a0] sm:$0xff] }
 0x27b   :  { %v1442_v34 = vrot.slane %v2919_v25, 5 }
 0x27c   :  { %v1334_v13 = vrot.slane %v2927_v27, 4  ;;  %v1153_v31 = vrot.slane %v2927_v27, 2  ;;  %v1127_v38 = vsel %vm617_vm1, %v1126_v36, %v2927_v27  ;;  %v1441_v39 = vrot.slane %v2927_v27, 6 }
 0x27e   :  { %v1336_v33 = vsel %vm617_vm1, %v1335_v30, %v1334_v13  ;;  %v1155_v35 = vsel %vm617_vm1, %v1154_v32, %v1153_v31  ;;  %v1443_v40 = vsel %vm617_vm1, %v1442_v34, %v1441_v39  ;;  %v1772_v30 = vld [vmem:[%s3127_s5 + $0x198] sm:$0xff]  ;;  %v1769_v39 = vld [vmem:[%s3127_s5 + $0x180] sm:$0xff] }
 0x27f   :  { %1338 = vrot.lane.b32.xlu0 %v1336_v33, %s2310_s13  ;;  %1157 = vrot.lane.b32.xlu1 %v1155_v35, %s2310_s13  ;;  %v1753_v33 = vld [vmem:[%s3127_s5 + $0x100] sm:$0xff]  ;;  %v1771_v35 = vld [vmem:[%s3127_s5 + $0x190] sm:$0xff] }
 0x283   :  { %1129 = vrot.lane.b32.xlu1 %v1127_v38, %s2310_s13 }
 0x287   :  { %1445 = vrot.lane.b32.xlu1 %v1443_v40, %s2310_s13  ;;  %v1560_v40 = vld [vmem:[%s3129_s7 + $0x18] sm:$0xff] }
 0x2f1   :  { %v1158_v41 = vpop.permute.xlu1 %1157  ;;  %v1339_v9 = vpop.permute.xlu0 %1338 }
 0x2f2   :  { %v1160_v43 = vrot.slane %v1158_v41, 6  ;;  %v1161_v44 = vrot.slane %v1158_v41, 7  ;;  %v1341_v4 = vrot.slane %v1339_v9, 4  ;;  %v1342_v5 = vrot.slane %v1339_v9, 5  ;;  %v1559_v41 = vld [vmem:[%s3129_s7 + $0x10] sm:$0xff] }
 0x2f4   :  { %v1164_v23 = vmax.f32 %v2927_v27, %v1160_v43  ;;  %v1165_v42 = vmax.f32 %v2919_v25, %v1161_v44  ;;  %v1345_v19 = vmax.f32 %v2927_v27, %v1341_v4  ;;  %v1346_v20 = vmax.f32 %v2919_v25, %v1342_v5  ;;  %v1558_v43 = vld [vmem:[%s3129_s7 + $0x8] sm:$0xff]  ;;  %v1557_v44 = vld [vmem:[%s3129_s7] sm:$0xff] }
 0x2f5   :  { %v1130_v45 = vpop.permute.xlu1 %1129 }
 0x2f6   :  { %v1185_v61 = vrot.slane %v1164_v23, 2  ;;  %v1186_v46 = vrot.slane %v1165_v42, 1  ;;  %v1132_v1 = vrot.slane %v1130_v45, 1  ;;  %v1135_v10 = vmax.f32 %v2927_v27, %v1130_v45 }
 0x2f7   :  { %v1366_v29 = vrot.slane %v1345_v19, 4  ;;  %v1367_v13 = vrot.slane %v1346_v20, 3 }
 0x2f8   :  { %v1187_v48 = vsel %vm617_vm1, %v1186_v46, %v1185_v61  ;;  %v1136_v49 = vmax.f32 %v2919_v25, %v1132_v1 }
 0x2f9   :  { %2164 = vmatmul.mubr.f32.vlgmr.msra.gmra.mxu0 %v1187_v48  ;;  %v1446_v16 = vpop.permute.xlu1 %1445 }
 0x2fa   :  { %2202 = vmatpush3.msra.mxu0 %v1768_v47  ;;  %2233 = vmatprep.mubr.msk.f32.mxu0 %vm2312_vm8, %v2311_v62  ;;  %v1261_v51 = vrot.slane %v1136_v49, 7  ;;  %v1448_v21 = vrot.slane %v1446_v16, 2  ;;  %v1449_v22 = vrot.slane %v1446_v16, 3 }
 0x2fb   :  { %2203 = vmatprep.subr.mxu0 %v2311_v62 }
 0x2fc   :  { %2204 = vmatpush3.msra.mxu0 %v1767_v50  ;;  %v1262_v54 = vsel %vm617_vm1, %v1261_v51, %v1135_v10  ;;  %v1452_v31 = vmax.f32 %v2927_v27, %v1448_v21  ;;  %v1453_v32 = vmax.f32 %v2919_v25, %v1449_v22  ;;  %v1368_v25 = vsel %vm617_vm1, %v1367_v13, %v1366_v29  ;;  %v1770_v27 = vld [vmem:[%s3127_s5 + $0x188] sm:$0xff]  ;;  %v1785_v50 = vld [vmem:[%s3128_s6] ss:$0 sm:$0xff] }
 0x2fd   :  { %2205 = vmatprep.subr.mxu0 %v2311_v62  ;;  %2199 = vmatmul.mubr.f32.vlgmr.msra.gmra.mxu1 %v1262_v54 }
 0x2fe   :  { %2206 = vmatpush3.msra.mxu0 %v1766_v52  ;;  %2237 = vmatpush3.msra.mxu1 %v1784_v53  ;;  %v1473_v36 = vrot.slane %v1452_v31, 6  ;;  %v1474_v38 = vrot.slane %v1453_v32, 5  ;;  %v1786_v53 = vld [vmem:[%s3130_s8] ss:$0 sm:$0xff] }
 0x2ff   :  { %2207 = vmatprep.subr.mxu0 %v2311_v62  ;;  %2238 = vmatprep.subr.mxu1 %v2311_v62 }
 0x300   :  { %2208 = vmatpush3.msra.mxu0 %v1765_v55  ;;  %2239 = vmatpush3.msra.mxu1 %v1783_v2  ;;  %v1475_v34 = vsel %vm617_vm1, %v1474_v38, %v1473_v36 }
 0x301   :  { %2209 = vmatprep.subr.mxu0 %v2311_v62  ;;  %2240 = vmatprep.subr.mxu1 %v2311_v62 }
 0x302   :  { %2210 = vmatpush3.msra.mxu0 %v1764_v56  ;;  %2241 = vmatpush3.msra.mxu1 %v1782_v57 }
 0x303   :  { %2211 = vmatprep.subr.mxu0 %v2311_v62  ;;  %2242 = vmatprep.subr.mxu1 %v2311_v62 }
 0x304   :  { %2212 = vmatpush3.msra.mxu0 %v1763_v58  ;;  %2243 = vmatpush3.msra.mxu1 %v1781_v59 }
 0x305   :  { %2213 = vmatprep.subr.mxu0 %v2311_v62  ;;  %2244 = vmatprep.subr.mxu1 %v2311_v62 }
 0x306   :  { %2214 = vmatpush3.msra.mxu0 %v1762_v0  ;;  %2245 = vmatpush3.msra.mxu1 %v1780_v60 }
 0x307   :  { %2215 = vmatprep.subr.mxu0 %v2311_v62  ;;  %2246 = vmatprep.subr.mxu1 %v2311_v62 }
 0x308   :  { %2216 = vmatpush3.msra.mxu0 %v1761_v63  ;;  %2247 = vmatpush3.msra.mxu1 %v1779_v3 }
 0x309   :  { %2217 = vmatprep.subr.mxu0 %v2311_v62  ;;  %2248 = vmatprep.subr.mxu1 %v2311_v62 }
 0x30a   :  { %2218 = vmatpush3.msra.mxu0 %v1760_v6  ;;  %2249 = vmatpush3.msra.mxu1 %v1778_v8 }
 0x30b   :  { %2219 = vmatprep.subr.mxu0 %v2311_v62  ;;  %2250 = vmatprep.subr.mxu1 %v2311_v62 }
 0x30c   :  { %2220 = vmatpush3.msra.mxu0 %v1759_v7  ;;  %2251 = vmatpush3.msra.mxu1 %v1777_v11 }
 0x30d   :  { %2221 = vmatprep.subr.mxu0 %v2311_v62  ;;  %2252 = vmatprep.subr.mxu1 %v2311_v62 }
 0x30e   :  { %2222 = vmatpush3.msra.mxu0 %v1758_v14  ;;  %2253 = vmatpush3.msra.mxu1 %v1776_v12 }
 0x30f   :  { %2223 = vmatprep.subr.mxu0 %v2311_v62  ;;  %2254 = vmatprep.subr.mxu1 %v2311_v62 }
 0x310   :  { %2224 = vmatpush3.msra.mxu0 %v1757_v15  ;;  %2255 = vmatpush3.msra.mxu1 %v1775_v28 }
 0x311   :  { %2225 = vmatprep.subr.mxu0 %v2311_v62  ;;  %2256 = vmatprep.subr.mxu1 %v2311_v62 }
 0x312   :  { %2226 = vmatpush3.msra.mxu0 %v1756_v18  ;;  %2257 = vmatpush3.msra.mxu1 %v1774_v37 }
 0x313   :  { %2227 = vmatprep.subr.mxu0 %v2311_v62  ;;  %2258 = vmatprep.subr.mxu1 %v2311_v62 }
 0x314   :  { %2228 = vmatpush3.msra.mxu0 %v1755_v24  ;;  %2259 = vmatpush3.msra.mxu1 %v1773_v17 }
 0x315   :  { %2229 = vmatprep.subr.mxu0 %v2311_v62  ;;  %2260 = vmatprep.subr.mxu1 %v2311_v62 }
 0x316   :  { %2230 = vmatpush3.msra.mxu0 %v1754_v26  ;;  %2261 = vmatpush3.msra.mxu1 %v1772_v30 }
 0x317   :  { %2231 = vmatprep.subr.mxu0 %v2311_v62  ;;  %2262 = vmatprep.subr.mxu1 %v2311_v62 }
 0x318   :  { %2232 = vmatpush3.msra.mxu0 %v1753_v33  ;;  %2263 = vmatpush3.msra.mxu1 %v1771_v35 }
 0x319   :  { %2234 = vmatmul.mubr.f32.vlgmr.msra.gmra.mxu0 %v1368_v25  ;;  %2264 = vmatprep.subr.mxu1 %v2311_v62 }
 0x31a   :  { %2268 = vmatprep.mubr.msk.f32.mxu1 %vm2312_vm8, %v2311_v62  ;;  %2265 = vmatpush3.msra.mxu1 %v1770_v27 }
 0x31b   :  { %2271 = vmatprep.subr.mxu0 %v2311_v62  ;;  %2266 = vmatprep.subr.mxu1 %v2311_v62 }
 0x31c   :  { %2279 = vmatprep.mubr.msk.f32.mxu0 %vm2312_vm8, %v2311_v62  ;;  %2267 = vmatpush3.msra.mxu1 %v1769_v39 }
 0x31d   :  { %2269 = vmatmul.mubr.f32.vlgmr.msra.gmra.mxu1 %v1475_v34  ;;  %2272 = vmatpush3.msra.mxu0 %v1560_v40 }
 0x31e   :  { %2273 = vmatprep.subr.mxu0 %v2311_v62 }
 0x31f   :  { %2274 = vmatpush3.msra.mxu0 %v1559_v41 }
 0x320   :  { %2275 = vmatprep.subr.mxu0 %v2311_v62 }
 0x321   :  { %2276 = vmatpush3.msra.mxu0 %v1558_v43 }
 0x322   :  { %2277 = vmatprep.subr.mxu0 %v2311_v62 }
 0x323   :  { %2278 = vmatpush3.msra.mxu0 %v1557_v44 }
 0x3b9   :  { %v1255_v23 = vpop.f32.mrf.mxu0 }
 0x3bb   :  { %v2165_v42 = vpop.f32.mrf.mxu0 }
 0x3bd   :  { %v1330_v45 = vpop.f32.mrf.mxu1 }
 0x3be   :  { %v1331_v1 = vadd.f32 %v1330_v45, %v1255_v23 }
 0x3bf   :  { %v2200_v61 = vpop.f32.mrf.mxu1 }
 0x3d9   :  { %v1436_v46 = vpop.f32.mrf.mxu0 }
 0x3da   :  { %v1440_v48 = vadd.f32 %v1436_v46, %v1331_v1 }
 0x3db   :  { %v2235_v47 = vpop.f32.mrf.mxu0 }
 0x3dd   :  { %v1543_v49 = vpop.f32.mrf.mxu1 }
 0x3de   :  { %v1547_v10 = vadd.f32 %v1543_v49, %v1440_v48 }
 0x3df   :  { %v2270_v62 = vpop.f32.mrf.mxu1 }
 0x3e0   :  { %v1555_v51 = vadd.f32 %v1785_v50, %v1547_v10 }
 0x3e2   :  { %v1556_v52 = vmax.f32 %v1555_v51, 0.0 }
 0x3e4   :  { %2280 = vmatmul.mubr.msk.f32.vlgmr.msra.gmra.mxu0 %vm1568_vm9, %v1556_v52 }
 0x4a4   :  { %v1638_v54 = vpop.f32.mrf.mxu0 }
 0x4a5   :  { %v1639_v55 = vadd.f32 %v1786_v53, %v1638_v54 }
 0x4a6   :  { %v2281_v2 = vpop.f32.mrf.mxu0 }
 0x4a7   :  { %1642 = vst [vmem:[#allocation3] sm:$0x3] %v1639_v55 }
 0x4a8   :  { %2298 = shalt.err (!%p2295_p4)
}
 0x4a9   :  { %1652 = dma.vmem_to_hbm [thread:$0]  %s1650_s19, 32, %s3131_s9, [#allocation4]  }
 0x4aa   :  { %2307 = dma.done.wait [#allocation4], 32  }
 0x4ab   :  { %2308 = vsyncadd [#allocation4], 4294967264 }
 0x4ac   :  { %1656 = vsyncpa [#allocation4], 1 }

</bundles_post_ra>
